<compile_context>
chip_gen: v7x
topology: tpu7x:2x2x1
jax: 0.10.0
libtpu: 0.0.40
codegen_flags: <defaults>
</compile_context>

<pallas_src>
import math

import numpy as np
import jax
import jax.numpy as jnp
from jax.experimental import pallas as pl
from jax.experimental.pallas import tpu as pltpu

# ------------------------- configuration (Args analogue) -------------------------
N         = 2     # batch
FEAT_DIM  = 8     # args.feature_dim
FILTERS   = 4     # args.filters   (C)
SEQ_LEN   = 16    # args.seq_len   (L)
KSIZE     = 2     # args.kernel_size
DILATION  = 4     # args.dilation  (number of TAB layers == number of heads H)
D_QKV     = 4     # args.d_qkv
D_FF      = 32    # args.d_ff
NUM_CLASS = 4     # args.num_class

D_MODEL = DILATION * D_QKV          # attention scale denominator
D_FLAT  = DILATION * FILTERS        # LayerNorm / fc width
LN_EPS  = 1e-5
BN_EPS  = 1e-5
INV_SQRT_DM = 1.0 / math.sqrt(D_MODEL)

assert (SEQ_LEN & (SEQ_LEN - 1)) == 0  # power of 2 (block-diag mask uses bitwise trick)

# ------------------------- packed weight slab layout (item: 1 DMA, not 21) -------------------------
SLAB_W   = 32                       # >= widest matrix (D_FF)
OFF_WF   = 0                        # [FEAT_DIM, C]          frontend 1x1 conv (+BN folded)
OFF_W1   = 8                        # 4 x [2C, C]            conv block 1, taps concatenated
OFF_W2   = 40                       # 4 x [2C, C]            conv block 2
OFF_WQKV = 72                       # [C, 3*D_QKV]           fused Q/K/V projection
OFF_WOB  = 80                       # [H*D_QKV, D_FLAT]      wo + channel-major interleave
OFF_WH1  = 96                       # [D_FLAT, D_FF]
OFF_WH2  = 112                      # [D_FF, D_FLAT]
OFF_WC1  = 144                      # [D_FLAT, 1]
OFF_WC2  = 160                      # [SEQ_LEN, NUM_CLASS]
VEC_BF   = 176                      # 1-row vectors below
VEC_B1   = 177                      # +l
VEC_B2   = 181                      # +l
VEC_BQKV = 185
VEC_BOF  = 186
VEC_LNG  = 187
VEC_LNB  = 188
VEC_BH1  = 189
VEC_BH2  = 190
VEC_BC2  = 191
TOTAL_ROWS = 192


# ============================ single fused kernel (grid=(N,)) ============================
def fused_kernel(xt_ref, slab_ref, out_ref):
    f32 = jnp.float32

    def vec(row, width):                      # [1, width] bias / gamma / beta row
        return slab_ref[row:row + 1, 0:width]

    def mat(row, nrows, width):               # static matrix slice from the packed slab
        return slab_ref[row:row + nrows, 0:width]

    # ---------------- frontend 1x1 conv (+folded BN) + ReLU, time-major [L, C] ----------------
    x = xt_ref[...]                                                      # [L, FEAT]
    now = jnp.maximum(
        jnp.dot(x, mat(OFF_WF, FEAT_DIM, FILTERS), preferred_element_type=f32)
        + vec(VEC_BF, FILTERS), 0.0)

    row_id = jax.lax.broadcasted_iota(jnp.int32, (SEQ_LEN, FILTERS), 0)  # hoisted, reused

    # ---------------- TAB_DIFF stack: dilated causal convs + sigmoid gate, deltas ----------------
    deltas = []
    skip = None
    for l in range(DILATION):
        d = 2 ** l
        h = now
        for blk in range(2):
            w_off = (OFF_W1 if blk == 0 else OFF_W2) + 8 * l
            b_row = (VEC_B1 if blk == 0 else VEC_B2) + l
            # register-resident causal shift: sublane roll (XLU) + iota mask (no VMEM trip)
            shifted = pltpu.roll(h, shift=d, axis=0)
            shifted = jnp.where(row_id >= d, shifted, 0.0)
            hcat = jnp.concatenate([shifted, h], axis=-1)                # [L, 2C] (both taps)
            h = jnp.maximum(
                jnp.dot(hcat, mat(w_off, 2 * FILTERS, FILTERS),
                        preferred_element_type=f32) + vec(b_row, FILTERS), 0.0)
        new = now * jax.nn.sigmoid(h)                                    # sigmoid-gated residual
        if skip is not None:
            deltas.append(new - skip)                                    # delta between skips
        skip = new
        now = new
    deltas.append(now)                                                   # H arrays of [L, C]

    # ---------------- all heads as ONE block-diagonal attention problem ----------------
    HL = DILATION * SEQ_LEN
    x_all = jnp.concatenate(deltas, axis=0)                              # [H*L, C] (registers)
    qkv = (jnp.dot(x_all, mat(OFF_WQKV, FILTERS, 3 * D_QKV), preferred_element_type=f32)
           + vec(VEC_BQKV, 3 * D_QKV))                                   # single fused Q/K/V dot
    q = qkv[:, 0:D_QKV]
    k = qkv[:, D_QKV:2 * D_QKV]
    v = qkv[:, 2 * D_QKV:3 * D_QKV]

    logits = jax.lax.dot_general(q, k, (((1,), (1,)), ((), ())),
                                 preferred_element_type=f32) * INV_SQRT_DM   # [H*L, H*L]
    # kill cross-head logits BEFORE the row max / exp (block-diagonal mask)
    rid = jax.lax.broadcasted_iota(jnp.int32, (HL, HL), 0)
    cid = jax.lax.broadcasted_iota(jnp.int32, (HL, HL), 1)
    same_head = (jnp.bitwise_and(rid, ~(SEQ_LEN - 1))
                 == jnp.bitwise_and(cid, ~(SEQ_LEN - 1)))
    logits = jnp.where(same_head, logits, jnp.float32(-1e30))
    mx = jnp.max(logits, axis=-1, keepdims=True)
    p = jnp.exp(logits - mx)
    attn = p * pl.reciprocal(jnp.sum(p, axis=-1, keepdims=True), approx=True)
    score_all = jnp.dot(attn, v, preferred_element_type=f32)             # [H*L, D_QKV]

    # output 1x1 conv + 'N H L C -> N L (C H)' interleave as ONE dot vs. a block matrix
    score_wide = jnp.concatenate(
        [score_all[hh * SEQ_LEN:(hh + 1) * SEQ_LEN, :] for hh in range(DILATION)], axis=-1)
    sflat = (jnp.dot(score_wide, mat(OFF_WOB, DILATION * D_QKV, D_FLAT),
                     preferred_element_type=f32) + vec(VEC_BOF, D_FLAT))  # [L, D_FLAT]
    # residual path 'N C L H -> N L (H C)' is exactly head-major: plain lane concat
    xflat = jnp.concatenate(deltas, axis=-1)                              # [L, D_FLAT]

    # ---------------- LayerNorm + residual FFN + LayerNorm + classifier ----------------
    ln_g = vec(VEC_LNG, D_FLAT)
    ln_b = vec(VEC_LNB, D_FLAT)

    def layernorm(s):
        mu = jnp.mean(s, axis=-1, keepdims=True)
        var = jnp.mean(jnp.square(s - mu), axis=-1, keepdims=True)
        return (s - mu) * jax.lax.rsqrt(var + LN_EPS) * ln_g + ln_b

    s1 = layernorm(sflat + xflat)
    hmid = jnp.maximum(jnp.dot(s1, mat(OFF_WH1, D_FLAT, D_FF), preferred_element_type=f32)
                       + vec(VEC_BH1, D_FF), 0.0)
    h2 = jnp.maximum(jnp.dot(hmid, mat(OFF_WH2, D_FF, D_FLAT), preferred_element_type=f32)
                     + vec(VEC_BH2, D_FLAT), 0.0)
    s2 = layernorm(h2 + s1)

    z = jnp.dot(s2, mat(OFF_WC1, D_FLAT, 1), preferred_element_type=f32)  # [L, 1]  (bc1 folded)
    out = jnp.sum(z * mat(OFF_WC2, SEQ_LEN, NUM_CLASS), axis=0, keepdims=True)
    out_ref[...] = out + vec(VEC_BC2, NUM_CLASS)


def forward(x, slab):
    # only XLA op outside the fused kernel: the tiny input relayout to time-major.
    xt = jnp.transpose(x, (0, 2, 1))                                      # [N, L, FEAT_DIM]
    out = pl.pallas_call(
        fused_kernel,
        out_shape=jax.ShapeDtypeStruct((N, 1, NUM_CLASS), jnp.float32),
        grid=(N,),
        in_specs=[
            pl.BlockSpec((None, SEQ_LEN, FEAT_DIM), lambda n: (n, 0, 0)),
            pl.BlockSpec((TOTAL_ROWS, SLAB_W), lambda n: (0, 0)),         # single packed weight slab
        ],
        out_specs=pl.BlockSpec((None, 1, NUM_CLASS), lambda n: (n, 0, 0)),
        # grid=(2,) + "parallel": each v7x TensorCore gets one sample; on single-TC parts
        # the grid is a cheap 2-step loop.  For realistic batches, widen the per-step
        # batch tile (stack samples along sublanes, mask the roll per sample).
        compiler_params=pltpu.CompilerParams(dimension_semantics=("parallel",)),
    )(xt, slab)
    return out[:, 0, :]


# =========================== kernel-side parameter preparation ===========================
def make_kernel_params(P):
    slab = np.zeros((TOTAL_ROWS, SLAB_W), np.float32)

    def put(row, arr):
        a = np.asarray(arr, np.float32)
        if a.ndim == 1:
            a = a[None, :]
        r, c = a.shape
        slab[row:row + r, 0:c] = a

    put(OFF_WF, np.asarray(P['wf_eff']).T)                           # [FEAT, C]
    put(VEC_BF, np.asarray(P['bf_eff'])[:, 0])                       # [C]

    tab_w1 = np.swapaxes(np.asarray(P['w1_eff']), -1, -2)            # [H, K, Cin, Cout]
    tab_w2 = np.swapaxes(np.asarray(P['w2_eff']), -1, -2)
    for l in range(DILATION):
        put(OFF_W1 + 8 * l, np.concatenate([tab_w1[l, 0], tab_w1[l, 1]], axis=0))  # [2C, C]
        put(OFF_W2 + 8 * l, np.concatenate([tab_w2[l, 0], tab_w2[l, 1]], axis=0))
        put(VEC_B1 + l, np.asarray(P['b1_eff'])[l][:, 0])
        put(VEC_B2 + l, np.asarray(P['b2_eff'])[l][:, 0])

    put(OFF_WQKV, np.concatenate([np.asarray(P['wq_t']), np.asarray(P['wk_t']),
                                  np.asarray(P['wv_t'])], axis=1))   # [C, 3*D_QKV]
    put(VEC_BQKV, np.concatenate([np.asarray(P['bq'])[0], np.asarray(P['bk'])[0],
                                  np.asarray(P['bv'])[0]], axis=0))

    # output 1x1 conv fused with the 'N H L C -> N L (C H)' interleave, one block matrix
    wo_t = np.asarray(P['wo_t']); bo = np.asarray(P['bo'])[0]
    wo_big = np.zeros((DILATION * D_QKV, D_FLAT), np.float32)
    bof = np.zeros((D_FLAT,), np.float32)
    for h in range(DILATION):
        for f in range(FILTERS):
            wo_big[h * D_QKV:(h + 1) * D_QKV, f * DILATION + h] = wo_t[:, f]
            bof[f * DILATION + h] = bo[f]
    put(OFF_WOB, wo_big)
    put(VEC_BOF, bof)

    put(VEC_LNG, np.asarray(P['ln_g'])[0])
    put(VEC_LNB, np.asarray(P['ln_b'])[0])
    put(OFF_WH1, P['w1_t'])
    put(VEC_BH1, np.asarray(P['fb1'])[0])
    put(OFF_WH2, P['w2_t'])
    put(VEC_BH2, np.asarray(P['fb2'])[0])
    put(OFF_WC1, P['wc1'])
    put(OFF_WC2, P['wc2_t'])
    bc2_eff = (np.asarray(P['bc1'])[0, 0] * np.asarray(P['wc2_t']).sum(axis=0)
               + np.asarray(P['bc2'])[0])                            # bc1 folded here
    put(VEC_BC2, bc2_eff)
    return jnp.asarray(slab)


# =========================== pure-JAX reference (for checking) ===========================
def ref_forward(x, P):
    now = jax.nn.relu(jnp.einsum('cf,nfl->ncl', P['wf_eff'], x) + P['bf_eff'][None])
    deltas, skip = [], None
    for l in range(DILATION):
        h = now
        for (w, b) in ((P['w1_eff'][l], P['b1_eff'][l]), (P['w2_eff'][l], P['b2_eff'][l])):
            acc = 0.0
            for k in range(KSIZE):
                shifted = jnp.einsum('ncl,lm->ncm', h, P['sh'][l, k])
                acc = acc + jnp.einsum('oc,ncl->nol', w[k], shifted)
            h = jax.nn.relu(acc + b[None])
        new = now * jax.nn.sigmoid(h)
        if skip is not None:
            deltas.append(new - skip)
        skip = new
        now = new
    deltas.append(now)
    ds = jnp.stack(deltas, axis=-1)                            # [N, C, L, H]

    xh = jnp.transpose(ds, (0, 3, 2, 1))                       # [N, H, L, C]
    q = jnp.einsum('nhlc,cd->nhld', xh, P['wq_t']) + P['bq'][0]
    k = jnp.einsum('nhlc,cd->nhld', xh, P['wk_t']) + P['bk'][0]
    v = jnp.einsum('nhlc,cd->nhld', xh, P['wv_t']) + P['bv'][0]
    logits = jnp.einsum('nhld,nhmd->nhlm', q, k) / math.sqrt(D_MODEL)
    attn = jax.nn.softmax(logits, axis=-1)
    score = jnp.einsum('nhlm,nhmd->nhld', attn, v)
    sc = jnp.einsum('nhld,df->nhlf', score, P['wo_t']) + P['bo'][0]
    score_flat = jnp.transpose(sc, (0, 2, 3, 1)).reshape(N, SEQ_LEN, D_FLAT)
    x_flat = jnp.transpose(ds, (0, 2, 3, 1)).reshape(N, SEQ_LEN, D_FLAT)

    def ln(s):
        mu = jnp.mean(s, -1, keepdims=True)
        var = jnp.mean((s - mu) ** 2, -1, keepdims=True)
        return (s - mu) / jnp.sqrt(var + LN_EPS) * P['ln_g'][0] + P['ln_b'][0]

    s1 = ln(score_flat + x_flat)
    h1 = jax.nn.relu(s1 @ P['w1_t'] + P['fb1'][0])
    h2 = jax.nn.relu(h1 @ P['w2_t'] + P['fb2'][0])
    s2 = ln(h2 + s1)
    z = s2 @ P['wc1'] + P['bc1'][0]                            # [N, L, 1]
    return jnp.einsum('nl,lc->nc', z[..., 0], P['wc2_t']) + P['bc2'][0]


# ================================ parameter init ================================
def init_params(key):
    keys = jax.random.split(key, 128)
    it = iter(keys)

    def nrm(shape, scale=0.2):
        return scale * jax.random.normal(next(it), shape, dtype=jnp.float32)

    P = {}
    # front Conv1d(FEAT_DIM->FILTERS, k=1) + BatchNorm1d (inference, folded) + ReLU
    wf, bf = nrm((FILTERS, FEAT_DIM)), nrm((FILTERS,), 0.1)
    g, be = 1.0 + nrm((FILTERS,), 0.1), nrm((FILTERS,), 0.1)
    s = g / jnp.sqrt(1.0 + BN_EPS)
    P['wf_eff'] = wf * s[:, None]
    P['bf_eff'] = (s * bf + be)[:, None]

    w1l, b1l, w2l, b2l, shl = [], [], [], [], []
    for l in range(DILATION):
        d = 2 ** l
        packs = []
        for _ in range(2):
            w = nrm((KSIZE, FILTERS, FILTERS))
            b = nrm((FILTERS,), 0.1)
            g = 1.0 + nrm((FILTERS,), 0.1)
            be = nrm((FILTERS,), 0.1)
            s = g / jnp.sqrt(1.0 + BN_EPS)
            packs.append((w * s[None, :, None], (s * b + be)[:, None]))
        w1l.append(packs[0][0]); b1l.append(packs[0][1])
        w2l.append(packs[1][0]); b2l.append(packs[1][1])
        sh_k = [jnp.asarray(np.eye(SEQ_LEN, k=(KSIZE - 1 - k) * d), dtype=jnp.float32)
                for k in range(KSIZE)]
        shl.append(jnp.stack(sh_k))
    P['w1_eff'] = jnp.stack(w1l); P['b1_eff'] = jnp.stack(b1l)
    P['w2_eff'] = jnp.stack(w2l); P['b2_eff'] = jnp.stack(b2l)
    P['sh'] = jnp.stack(shl)                                   # [H, K, L, L]  (ref only)

    # TIM_Attention params (1x1 convs passed transposed: [C_in, C_out])
    P['wq_t'], P['bq'] = nrm((FILTERS, D_QKV)), nrm((1, D_QKV), 0.1)
    P['wk_t'], P['bk'] = nrm((FILTERS, D_QKV)), nrm((1, D_QKV), 0.1)
    P['wv_t'], P['bv'] = nrm((FILTERS, D_QKV)), nrm((1, D_QKV), 0.1)
    P['wo_t'], P['bo'] = nrm((D_QKV, FILTERS)), nrm((1, FILTERS), 0.1)
    P['ln_g'] = 1.0 + nrm((1, D_FLAT), 0.1)
    P['ln_b'] = nrm((1, D_FLAT), 0.1)
    P['w1_t'], P['fb1'] = nrm((D_FLAT, D_FF)), nrm((1, D_FF), 0.1)
    P['w2_t'], P['fb2'] = nrm((D_FF, D_FLAT)), nrm((1, D_FLAT), 0.1)
    # classifier: Linear(D_FLAT->1), Linear(SEQ_LEN->NUM_CLASS)
    P['wc1'], P['bc1'] = nrm((D_FLAT, 1)), nrm((1, 1), 0.1)
    P['wc2_t'], P['bc2'] = nrm((SEQ_LEN, NUM_CLASS)), nrm((1, NUM_CLASS), 0.1)
    return P


# ==================================== main ====================================
if __name__ == "__main__":
    key = jax.random.PRNGKey(0)
    kx, kp = jax.random.split(key)
    x = jax.random.normal(kx, (N, FEAT_DIM, SEQ_LEN), dtype=jnp.float32)
    P = init_params(kp)
    slab = make_kernel_params(P)

    out = jax.jit(forward)(x, slab)
    out = jax.block_until_ready(out)
    assert out.shape == (N, NUM_CLASS)

    ref = ref_forward(x, P)
    np.testing.assert_allclose(np.asarray(out), np.asarray(ref), rtol=5e-2, atol=5e-2)

    print("KERNEL_OK")
</pallas_src>

<mosaic_0001>
module attributes {stable_mosaic.version = 11 : i64} {
  func.func @fused_kernel(%arg0: i32, %arg1: memref<1x16x8xf32, #tpu.memory_space<vmem>>, %arg2: memref<192x32xf32, #tpu.memory_space<vmem>>, %arg3: memref<1x1x4xf32, #tpu.memory_space<vmem>>) attributes {dimension_semantics = [#tpu.dimension_semantics<parallel>], iteration_bounds = array<i64: 2>, scalar_prefetch = 0 : i64, scratch_operands = 0 : i64, tpu.core_type = #tpu.core_type<tc>, window_params = [{transform_indices = @transform_0, window_bounds = array<i64: 1, 16, 8>}, {pipeline_mode = #tpu.pipeline_mode<synchronous>, transform_indices = @transform_1, window_bounds = array<i64: 192, 32>}, {transform_indices = @transform_2, window_bounds = array<i64: 1, 1, 4>}]} {
    %c0 = arith.constant 0 : index
    %c0_0 = arith.constant 0 : index
    %c0_1 = arith.constant 0 : index
    %0 = vector.load %arg1[%c0, %c0_0, %c0_1] : memref<1x16x8xf32, #tpu.memory_space<vmem>>, vector<1x16x8xf32>
    %1 = vector.shape_cast %0 : vector<1x16x8xf32> to vector<16x8xf32>
    %c0_2 = arith.constant 0 : index
    %c0_3 = arith.constant 0 : index
    %2 = vector.load %arg2[%c0_2, %c0_3] : memref<192x32xf32, #tpu.memory_space<vmem>>, vector<8x4xf32>
    %cst = arith.constant dense<0.000000e+00> : vector<16x4xf32>
    %3 = tpu.matmul %1, %2, %cst {dimension_numbers = #tpu.dot_dimension_numbers<[1], [0], [0], [1], [0, 0, 1, 1], [], []>} : vector<16x8xf32>, vector<8x4xf32>, vector<16x4xf32> -> vector<16x4xf32>
    %c176 = arith.constant 176 : index
    %c0_4 = arith.constant 0 : index
    %4 = vector.load %arg2[%c176, %c0_4] : memref<192x32xf32, #tpu.memory_space<vmem>>, vector<1x4xf32>
    %5 = vector.broadcast %4 : vector<1x4xf32> to vector<16x4xf32>
    %6 = arith.addf %3, %5 : vector<16x4xf32>
    %cst_5 = arith.constant 0.000000e+00 : f32
    %7 = vector.broadcast %cst_5 : f32 to vector<16x4xf32>
    %8 = arith.maximumf %6, %7 : vector<16x4xf32>
    %9 = tpu.iota {dimensions = array<i32: 0>} : vector<16x4xi32>
    %c1_i32 = arith.constant 1 : i32
    %10 = tpu.dynamic_rotate %8 by %c1_i32 dim 0 : vector<16x4xf32>, i32 -> vector<16x4xf32>
    %c1_i32_6 = arith.constant 1 : i32
    %11 = vector.broadcast %c1_i32_6 : i32 to vector<16x4xi32>
    %12 = arith.cmpi sge, %9, %11 : vector<16x4xi32>
    %cst_7 = arith.constant 0.000000e+00 : f32
    %13 = vector.broadcast %cst_7 : f32 to vector<16x4xf32>
    %14 = arith.select %12, %10, %13 : vector<16x4xi1>, vector<16x4xf32>
    %15 = tpu.concatenate %14, %8 in 1 : vector<16x4xf32>, vector<16x4xf32> -> vector<16x8xf32>
    %c8 = arith.constant 8 : index
    %c0_8 = arith.constant 0 : index
    %16 = vector.load %arg2[%c8, %c0_8] : memref<192x32xf32, #tpu.memory_space<vmem>>, vector<8x4xf32>
    %cst_9 = arith.constant dense<0.000000e+00> : vector<16x4xf32>
    %17 = tpu.matmul %15, %16, %cst_9 {dimension_numbers = #tpu.dot_dimension_numbers<[1], [0], [0], [1], [0, 0, 1, 1], [], []>} : vector<16x8xf32>, vector<8x4xf32>, vector<16x4xf32> -> vector<16x4xf32>
    %c177 = arith.constant 177 : index
    %c0_10 = arith.constant 0 : index
    %18 = vector.load %arg2[%c177, %c0_10] : memref<192x32xf32, #tpu.memory_space<vmem>>, vector<1x4xf32>
    %19 = vector.broadcast %18 : vector<1x4xf32> to vector<16x4xf32>
    %20 = arith.addf %17, %19 : vector<16x4xf32>
    %cst_11 = arith.constant 0.000000e+00 : f32
    %21 = vector.broadcast %cst_11 : f32 to vector<16x4xf32>
    %22 = arith.maximumf %20, %21 : vector<16x4xf32>
    %c1_i32_12 = arith.constant 1 : i32
    %23 = tpu.dynamic_rotate %22 by %c1_i32_12 dim 0 : vector<16x4xf32>, i32 -> vector<16x4xf32>
    %c1_i32_13 = arith.constant 1 : i32
    %24 = vector.broadcast %c1_i32_13 : i32 to vector<16x4xi32>
    %25 = arith.cmpi sge, %9, %24 : vector<16x4xi32>
    %cst_14 = arith.constant 0.000000e+00 : f32
    %26 = vector.broadcast %cst_14 : f32 to vector<16x4xf32>
    %27 = arith.select %25, %23, %26 : vector<16x4xi1>, vector<16x4xf32>
    %28 = tpu.concatenate %27, %22 in 1 : vector<16x4xf32>, vector<16x4xf32> -> vector<16x8xf32>
    %c40 = arith.constant 40 : index
    %c0_15 = arith.constant 0 : index
    %29 = vector.load %arg2[%c40, %c0_15] : memref<192x32xf32, #tpu.memory_space<vmem>>, vector<8x4xf32>
    %cst_16 = arith.constant dense<0.000000e+00> : vector<16x4xf32>
    %30 = tpu.matmul %28, %29, %cst_16 {dimension_numbers = #tpu.dot_dimension_numbers<[1], [0], [0], [1], [0, 0, 1, 1], [], []>} : vector<16x8xf32>, vector<8x4xf32>, vector<16x4xf32> -> vector<16x4xf32>
    %c181 = arith.constant 181 : index
    %c0_17 = arith.constant 0 : index
    %31 = vector.load %arg2[%c181, %c0_17] : memref<192x32xf32, #tpu.memory_space<vmem>>, vector<1x4xf32>
    %32 = vector.broadcast %31 : vector<1x4xf32> to vector<16x4xf32>
    %33 = arith.addf %30, %32 : vector<16x4xf32>
    %cst_18 = arith.constant 0.000000e+00 : f32
    %34 = vector.broadcast %cst_18 : f32 to vector<16x4xf32>
    %35 = arith.maximumf %33, %34 : vector<16x4xf32>
    %36 = arith.negf %35 : vector<16x4xf32>
    %37 = math.exp %36 : vector<16x4xf32>
    %cst_19 = arith.constant 1.000000e+00 : f32
    %38 = vector.broadcast %cst_19 : f32 to vector<16x4xf32>
    %39 = arith.addf %38, %37 : vector<16x4xf32>
    %40 = arith.divf %38, %39 : vector<16x4xf32>
    %41 = arith.mulf %8, %40 : vector<16x4xf32>
    %c2_i32 = arith.constant 2 : i32
    %42 = tpu.dynamic_rotate %41 by %c2_i32 dim 0 : vector<16x4xf32>, i32 -> vector<16x4xf32>
    %c2_i32_20 = arith.constant 2 : i32
    %43 = vector.broadcast %c2_i32_20 : i32 to vector<16x4xi32>
    %44 = arith.cmpi sge, %9, %43 : vector<16x4xi32>
    %cst_21 = arith.constant 0.000000e+00 : f32
    %45 = vector.broadcast %cst_21 : f32 to vector<16x4xf32>
    %46 = arith.select %44, %42, %45 : vector<16x4xi1>, vector<16x4xf32>
    %47 = tpu.concatenate %46, %41 in 1 : vector<16x4xf32>, vector<16x4xf32> -> vector<16x8xf32>
    %c16 = arith.constant 16 : index
    %c0_22 = arith.constant 0 : index
    %48 = vector.load %arg2[%c16, %c0_22] : memref<192x32xf32, #tpu.memory_space<vmem>>, vector<8x4xf32>
    %cst_23 = arith.constant dense<0.000000e+00> : vector<16x4xf32>
    %49 = tpu.matmul %47, %48, %cst_23 {dimension_numbers = #tpu.dot_dimension_numbers<[1], [0], [0], [1], [0, 0, 1, 1], [], []>} : vector<16x8xf32>, vector<8x4xf32>, vector<16x4xf32> -> vector<16x4xf32>
    %c178 = arith.constant 178 : index
    %c0_24 = arith.constant 0 : index
    %50 = vector.load %arg2[%c178, %c0_24] : memref<192x32xf32, #tpu.memory_space<vmem>>, vector<1x4xf32>
    %51 = vector.broadcast %50 : vector<1x4xf32> to vector<16x4xf32>
    %52 = arith.addf %49, %51 : vector<16x4xf32>
    %cst_25 = arith.constant 0.000000e+00 : f32
    %53 = vector.broadcast %cst_25 : f32 to vector<16x4xf32>
    %54 = arith.maximumf %52, %53 : vector<16x4xf32>
    %c2_i32_26 = arith.constant 2 : i32
    %55 = tpu.dynamic_rotate %54 by %c2_i32_26 dim 0 : vector<16x4xf32>, i32 -> vector<16x4xf32>
    %c2_i32_27 = arith.constant 2 : i32
    %56 = vector.broadcast %c2_i32_27 : i32 to vector<16x4xi32>
    %57 = arith.cmpi sge, %9, %56 : vector<16x4xi32>
    %cst_28 = arith.constant 0.000000e+00 : f32
    %58 = vector.broadcast %cst_28 : f32 to vector<16x4xf32>
    %59 = arith.select %57, %55, %58 : vector<16x4xi1>, vector<16x4xf32>
    %60 = tpu.concatenate %59, %54 in 1 : vector<16x4xf32>, vector<16x4xf32> -> vector<16x8xf32>
    %c48 = arith.constant 48 : index
    %c0_29 = arith.constant 0 : index
    %61 = vector.load %arg2[%c48, %c0_29] : memref<192x32xf32, #tpu.memory_space<vmem>>, vector<8x4xf32>
    %cst_30 = arith.constant dense<0.000000e+00> : vector<16x4xf32>
    %62 = tpu.matmul %60, %61, %cst_30 {dimension_numbers = #tpu.dot_dimension_numbers<[1], [0], [0], [1], [0, 0, 1, 1], [], []>} : vector<16x8xf32>, vector<8x4xf32>, vector<16x4xf32> -> vector<16x4xf32>
    %c182 = arith.constant 182 : index
    %c0_31 = arith.constant 0 : index
    %63 = vector.load %arg2[%c182, %c0_31] : memref<192x32xf32, #tpu.memory_space<vmem>>, vector<1x4xf32>
    %64 = vector.broadcast %63 : vector<1x4xf32> to vector<16x4xf32>
    %65 = arith.addf %62, %64 : vector<16x4xf32>
    %cst_32 = arith.constant 0.000000e+00 : f32
    %66 = vector.broadcast %cst_32 : f32 to vector<16x4xf32>
    %67 = arith.maximumf %65, %66 : vector<16x4xf32>
    %68 = arith.negf %67 : vector<16x4xf32>
    %69 = math.exp %68 : vector<16x4xf32>
    %cst_33 = arith.constant 1.000000e+00 : f32
    %70 = vector.broadcast %cst_33 : f32 to vector<16x4xf32>
    %71 = arith.addf %70, %69 : vector<16x4xf32>
    %72 = arith.divf %70, %71 : vector<16x4xf32>
    %73 = arith.mulf %41, %72 : vector<16x4xf32>
    %74 = arith.subf %73, %41 : vector<16x4xf32>
    %c4_i32 = arith.constant 4 : i32
    %75 = tpu.dynamic_rotate %73 by %c4_i32 dim 0 : vector<16x4xf32>, i32 -> vector<16x4xf32>
    %c4_i32_34 = arith.constant 4 : i32
    %76 = vector.broadcast %c4_i32_34 : i32 to vector<16x4xi32>
    %77 = arith.cmpi sge, %9, %76 : vector<16x4xi32>
    %cst_35 = arith.constant 0.000000e+00 : f32
    %78 = vector.broadcast %cst_35 : f32 to vector<16x4xf32>
    %79 = arith.select %77, %75, %78 : vector<16x4xi1>, vector<16x4xf32>
    %80 = tpu.concatenate %79, %73 in 1 : vector<16x4xf32>, vector<16x4xf32> -> vector<16x8xf32>
    %c24 = arith.constant 24 : index
    %c0_36 = arith.constant 0 : index
    %81 = vector.load %arg2[%c24, %c0_36] : memref<192x32xf32, #tpu.memory_space<vmem>>, vector<8x4xf32>
    %cst_37 = arith.constant dense<0.000000e+00> : vector<16x4xf32>
    %82 = tpu.matmul %80, %81, %cst_37 {dimension_numbers = #tpu.dot_dimension_numbers<[1], [0], [0], [1], [0, 0, 1, 1], [], []>} : vector<16x8xf32>, vector<8x4xf32>, vector<16x4xf32> -> vector<16x4xf32>
    %c179 = arith.constant 179 : index
    %c0_38 = arith.constant 0 : index
    %83 = vector.load %arg2[%c179, %c0_38] : memref<192x32xf32, #tpu.memory_space<vmem>>, vector<1x4xf32>
    %84 = vector.broadcast %83 : vector<1x4xf32> to vector<16x4xf32>
    %85 = arith.addf %82, %84 : vector<16x4xf32>
    %cst_39 = arith.constant 0.000000e+00 : f32
    %86 = vector.broadcast %cst_39 : f32 to vector<16x4xf32>
    %87 = arith.maximumf %85, %86 : vector<16x4xf32>
    %c4_i32_40 = arith.constant 4 : i32
    %88 = tpu.dynamic_rotate %87 by %c4_i32_40 dim 0 : vector<16x4xf32>, i32 -> vector<16x4xf32>
    %c4_i32_41 = arith.constant 4 : i32
    %89 = vector.broadcast %c4_i32_41 : i32 to vector<16x4xi32>
    %90 = arith.cmpi sge, %9, %89 : vector<16x4xi32>
    %cst_42 = arith.constant 0.000000e+00 : f32
    %91 = vector.broadcast %cst_42 : f32 to vector<16x4xf32>
    %92 = arith.select %90, %88, %91 : vector<16x4xi1>, vector<16x4xf32>
    %93 = tpu.concatenate %92, %87 in 1 : vector<16x4xf32>, vector<16x4xf32> -> vector<16x8xf32>
    %c56 = arith.constant 56 : index
    %c0_43 = arith.constant 0 : index
    %94 = vector.load %arg2[%c56, %c0_43] : memref<192x32xf32, #tpu.memory_space<vmem>>, vector<8x4xf32>
    %cst_44 = arith.constant dense<0.000000e+00> : vector<16x4xf32>
    %95 = tpu.matmul %93, %94, %cst_44 {dimension_numbers = #tpu.dot_dimension_numbers<[1], [0], [0], [1], [0, 0, 1, 1], [], []>} : vector<16x8xf32>, vector<8x4xf32>, vector<16x4xf32> -> vector<16x4xf32>
    %c183 = arith.constant 183 : index
    %c0_45 = arith.constant 0 : index
    %96 = vector.load %arg2[%c183, %c0_45] : memref<192x32xf32, #tpu.memory_space<vmem>>, vector<1x4xf32>
    %97 = vector.broadcast %96 : vector<1x4xf32> to vector<16x4xf32>
    %98 = arith.addf %95, %97 : vector<16x4xf32>
    %cst_46 = arith.constant 0.000000e+00 : f32
    %99 = vector.broadcast %cst_46 : f32 to vector<16x4xf32>
    %100 = arith.maximumf %98, %99 : vector<16x4xf32>
    %101 = arith.negf %100 : vector<16x4xf32>
    %102 = math.exp %101 : vector<16x4xf32>
    %cst_47 = arith.constant 1.000000e+00 : f32
    %103 = vector.broadcast %cst_47 : f32 to vector<16x4xf32>
    %104 = arith.addf %103, %102 : vector<16x4xf32>
    %105 = arith.divf %103, %104 : vector<16x4xf32>
    %106 = arith.mulf %73, %105 : vector<16x4xf32>
    %107 = arith.subf %106, %73 : vector<16x4xf32>
    %c8_i32 = arith.constant 8 : i32
    %108 = tpu.dynamic_rotate %106 by %c8_i32 dim 0 : vector<16x4xf32>, i32 -> vector<16x4xf32>
    %c8_i32_48 = arith.constant 8 : i32
    %109 = vector.broadcast %c8_i32_48 : i32 to vector<16x4xi32>
    %110 = arith.cmpi sge, %9, %109 : vector<16x4xi32>
    %cst_49 = arith.constant 0.000000e+00 : f32
    %111 = vector.broadcast %cst_49 : f32 to vector<16x4xf32>
    %112 = arith.select %110, %108, %111 : vector<16x4xi1>, vector<16x4xf32>
    %113 = tpu.concatenate %112, %106 in 1 : vector<16x4xf32>, vector<16x4xf32> -> vector<16x8xf32>
    %c32 = arith.constant 32 : index
    %c0_50 = arith.constant 0 : index
    %114 = vector.load %arg2[%c32, %c0_50] : memref<192x32xf32, #tpu.memory_space<vmem>>, vector<8x4xf32>
    %cst_51 = arith.constant dense<0.000000e+00> : vector<16x4xf32>
    %115 = tpu.matmul %113, %114, %cst_51 {dimension_numbers = #tpu.dot_dimension_numbers<[1], [0], [0], [1], [0, 0, 1, 1], [], []>} : vector<16x8xf32>, vector<8x4xf32>, vector<16x4xf32> -> vector<16x4xf32>
    %c180 = arith.constant 180 : index
    %c0_52 = arith.constant 0 : index
    %116 = vector.load %arg2[%c180, %c0_52] : memref<192x32xf32, #tpu.memory_space<vmem>>, vector<1x4xf32>
    %117 = vector.broadcast %116 : vector<1x4xf32> to vector<16x4xf32>
    %118 = arith.addf %115, %117 : vector<16x4xf32>
    %cst_53 = arith.constant 0.000000e+00 : f32
    %119 = vector.broadcast %cst_53 : f32 to vector<16x4xf32>
    %120 = arith.maximumf %118, %119 : vector<16x4xf32>
    %c8_i32_54 = arith.constant 8 : i32
    %121 = tpu.dynamic_rotate %120 by %c8_i32_54 dim 0 : vector<16x4xf32>, i32 -> vector<16x4xf32>
    %c8_i32_55 = arith.constant 8 : i32
    %122 = vector.broadcast %c8_i32_55 : i32 to vector<16x4xi32>
    %123 = arith.cmpi sge, %9, %122 : vector<16x4xi32>
    %cst_56 = arith.constant 0.000000e+00 : f32
    %124 = vector.broadcast %cst_56 : f32 to vector<16x4xf32>
    %125 = arith.select %123, %121, %124 : vector<16x4xi1>, vector<16x4xf32>
    %126 = tpu.concatenate %125, %120 in 1 : vector<16x4xf32>, vector<16x4xf32> -> vector<16x8xf32>
    %c64 = arith.constant 64 : index
    %c0_57 = arith.constant 0 : index
    %127 = vector.load %arg2[%c64, %c0_57] : memref<192x32xf32, #tpu.memory_space<vmem>>, vector<8x4xf32>
    %cst_58 = arith.constant dense<0.000000e+00> : vector<16x4xf32>
    %128 = tpu.matmul %126, %127, %cst_58 {dimension_numbers = #tpu.dot_dimension_numbers<[1], [0], [0], [1], [0, 0, 1, 1], [], []>} : vector<16x8xf32>, vector<8x4xf32>, vector<16x4xf32> -> vector<16x4xf32>
    %c184 = arith.constant 184 : index
    %c0_59 = arith.constant 0 : index
    %129 = vector.load %arg2[%c184, %c0_59] : memref<192x32xf32, #tpu.memory_space<vmem>>, vector<1x4xf32>
    %130 = vector.broadcast %129 : vector<1x4xf32> to vector<16x4xf32>
    %131 = arith.addf %128, %130 : vector<16x4xf32>
    %cst_60 = arith.constant 0.000000e+00 : f32
    %132 = vector.broadcast %cst_60 : f32 to vector<16x4xf32>
    %133 = arith.maximumf %131, %132 : vector<16x4xf32>
    %134 = arith.negf %133 : vector<16x4xf32>
    %135 = math.exp %134 : vector<16x4xf32>
    %cst_61 = arith.constant 1.000000e+00 : f32
    %136 = vector.broadcast %cst_61 : f32 to vector<16x4xf32>
    %137 = arith.addf %136, %135 : vector<16x4xf32>
    %138 = arith.divf %136, %137 : vector<16x4xf32>
    %139 = arith.mulf %106, %138 : vector<16x4xf32>
    %140 = arith.subf %139, %106 : vector<16x4xf32>
    %141 = tpu.concatenate %74, %107, %140, %139 in 0 : vector<16x4xf32>, vector<16x4xf32>, vector<16x4xf32>, vector<16x4xf32> -> vector<64x4xf32>
    %c72 = arith.constant 72 : index
    %c0_62 = arith.constant 0 : index
    %142 = vector.load %arg2[%c72, %c0_62] : memref<192x32xf32, #tpu.memory_space<vmem>>, vector<4x12xf32>
    %cst_63 = arith.constant dense<0.000000e+00> : vector<64x12xf32>
    %143 = tpu.matmul %141, %142, %cst_63 {dimension_numbers = #tpu.dot_dimension_numbers<[1], [0], [0], [1], [0, 0, 1, 1], [], []>} : vector<64x4xf32>, vector<4x12xf32>, vector<64x12xf32> -> vector<64x12xf32>
    %c185 = arith.constant 185 : index
    %c0_64 = arith.constant 0 : index
    %144 = vector.load %arg2[%c185, %c0_64] : memref<192x32xf32, #tpu.memory_space<vmem>>, vector<1x12xf32>
    %145 = vector.broadcast %144 : vector<1x12xf32> to vector<64x12xf32>
    %146 = arith.addf %143, %145 : vector<64x12xf32>
    %147 = vector.extract_strided_slice %146 {offsets = [0, 0], sizes = [64, 4], strides = [1, 1]} : vector<64x12xf32> to vector<64x4xf32>
    %148 = vector.extract_strided_slice %146 {offsets = [0, 4], sizes = [64, 4], strides = [1, 1]} : vector<64x12xf32> to vector<64x4xf32>
    %149 = vector.extract_strided_slice %146 {offsets = [0, 8], sizes = [64, 4], strides = [1, 1]} : vector<64x12xf32> to vector<64x4xf32>
    %cst_65 = arith.constant dense<0.000000e+00> : vector<64x64xf32>
    %150 = tpu.matmul %147, %148, %cst_65 {dimension_numbers = #tpu.dot_dimension_numbers<[1], [1], [0], [0], [0, 0, 1, 0], [], []>} : vector<64x4xf32>, vector<64x4xf32>, vector<64x64xf32> -> vector<64x64xf32>
    %cst_66 = arith.constant 2.500000e-01 : f32
    %151 = vector.broadcast %cst_66 : f32 to vector<64x64xf32>
    %152 = arith.mulf %150, %151 : vector<64x64xf32>
    %153 = tpu.iota {dimensions = array<i32: 0>} : vector<64x64xi32>
    %154 = tpu.iota {dimensions = array<i32: 1>} : vector<64x64xi32>
    %c-16_i32 = arith.constant -16 : i32
    %155 = vector.broadcast %c-16_i32 : i32 to vector<64x64xi32>
    %156 = arith.andi %153, %155 : vector<64x64xi32>
    %c-16_i32_67 = arith.constant -16 : i32
    %157 = vector.broadcast %c-16_i32_67 : i32 to vector<64x64xi32>
    %158 = arith.andi %154, %157 : vector<64x64xi32>
    %159 = arith.cmpi eq, %156, %158 : vector<64x64xi32>
    %cst_68 = arith.constant -1.000000e+30 : f32
    %160 = vector.broadcast %cst_68 : f32 to vector<64x64xf32>
    %161 = arith.select %159, %152, %160 : vector<64x64xi1>, vector<64x64xf32>
    %cst_69 = arith.constant dense<0xFF800000> : vector<64xf32>
    %162 = vector.multi_reduction <maximumf>, %161, %cst_69 [1] : vector<64x64xf32> to vector<64xf32>
    %163 = vector.shape_cast %162 : vector<64xf32> to vector<64x1xf32>
    %164 = vector.broadcast %163 : vector<64x1xf32> to vector<64x64xf32>
    %165 = arith.subf %161, %164 : vector<64x64xf32>
    %166 = math.exp %165 : vector<64x64xf32>
    %cst_70 = arith.constant dense<0.000000e+00> : vector<64xf32>
    %167 = vector.multi_reduction <add>, %166, %cst_70 [1] : vector<64x64xf32> to vector<64xf32>
    %168 = vector.shape_cast %167 : vector<64xf32> to vector<64x1xf32>
    %169 = tpu.reciprocal %168 {approx = true} : vector<64x1xf32> -> vector<64x1xf32>
    %170 = vector.broadcast %169 : vector<64x1xf32> to vector<64x64xf32>
    %171 = arith.mulf %166, %170 : vector<64x64xf32>
    %cst_71 = arith.constant dense<0.000000e+00> : vector<64x4xf32>
    %172 = tpu.matmul %171, %149, %cst_71 {dimension_numbers = #tpu.dot_dimension_numbers<[1], [0], [0], [1], [0, 0, 1, 1], [], []>} : vector<64x64xf32>, vector<64x4xf32>, vector<64x4xf32> -> vector<64x4xf32>
    %173 = vector.extract_strided_slice %172 {offsets = [0, 0], sizes = [16, 4], strides = [1, 1]} : vector<64x4xf32> to vector<16x4xf32>
    %174 = vector.extract_strided_slice %172 {offsets = [16, 0], sizes = [16, 4], strides = [1, 1]} : vector<64x4xf32> to vector<16x4xf32>
    %175 = vector.extract_strided_slice %172 {offsets = [32, 0], sizes = [16, 4], strides = [1, 1]} : vector<64x4xf32> to vector<16x4xf32>
    %176 = vector.extract_strided_slice %172 {offsets = [48, 0], sizes = [16, 4], strides = [1, 1]} : vector<64x4xf32> to vector<16x4xf32>
    %177 = tpu.concatenate %173, %174, %175, %176 in 1 : vector<16x4xf32>, vector<16x4xf32>, vector<16x4xf32>, vector<16x4xf32> -> vector<16x16xf32>
    %c80 = arith.constant 80 : index
    %c0_72 = arith.constant 0 : index
    %178 = vector.load %arg2[%c80, %c0_72] : memref<192x32xf32, #tpu.memory_space<vmem>>, vector<16x16xf32>
    %cst_73 = arith.constant dense<0.000000e+00> : vector<16x16xf32>
    %179 = tpu.matmul %177, %178, %cst_73 {dimension_numbers = #tpu.dot_dimension_numbers<[1], [0], [0], [1], [0, 0, 1, 1], [], []>} : vector<16x16xf32>, vector<16x16xf32>, vector<16x16xf32> -> vector<16x16xf32>
    %c186 = arith.constant 186 : index
    %c0_74 = arith.constant 0 : index
    %180 = vector.load %arg2[%c186, %c0_74] : memref<192x32xf32, #tpu.memory_space<vmem>>, vector<1x16xf32>
    %181 = vector.broadcast %180 : vector<1x16xf32> to vector<16x16xf32>
    %182 = arith.addf %179, %181 : vector<16x16xf32>
    %183 = tpu.concatenate %74, %107, %140, %139 in 1 : vector<16x4xf32>, vector<16x4xf32>, vector<16x4xf32>, vector<16x4xf32> -> vector<16x16xf32>
    %c187 = arith.constant 187 : index
    %c0_75 = arith.constant 0 : index
    %184 = vector.load %arg2[%c187, %c0_75] : memref<192x32xf32, #tpu.memory_space<vmem>>, vector<1x16xf32>
    %c188 = arith.constant 188 : index
    %c0_76 = arith.constant 0 : index
    %185 = vector.load %arg2[%c188, %c0_76] : memref<192x32xf32, #tpu.memory_space<vmem>>, vector<1x16xf32>
    %186 = arith.addf %182, %183 : vector<16x16xf32>
    %cst_77 = arith.constant dense<0.000000e+00> : vector<16xf32>
    %187 = vector.multi_reduction <add>, %186, %cst_77 [1] : vector<16x16xf32> to vector<16xf32>
    %188 = vector.shape_cast %187 : vector<16xf32> to vector<16x1xf32>
    %cst_78 = arith.constant 1.600000e+01 : f32
    %189 = vector.broadcast %cst_78 : f32 to vector<16x1xf32>
    %190 = arith.divf %188, %189 : vector<16x1xf32>
    %191 = vector.broadcast %190 : vector<16x1xf32> to vector<16x16xf32>
    %192 = arith.subf %186, %191 : vector<16x16xf32>
    %193 = arith.mulf %192, %192 : vector<16x16xf32>
    %cst_79 = arith.constant dense<0.000000e+00> : vector<16xf32>
    %194 = vector.multi_reduction <add>, %193, %cst_79 [1] : vector<16x16xf32> to vector<16xf32>
    %195 = vector.shape_cast %194 : vector<16xf32> to vector<16x1xf32>
    %cst_80 = arith.constant 1.600000e+01 : f32
    %196 = vector.broadcast %cst_80 : f32 to vector<16x1xf32>
    %197 = arith.divf %195, %196 : vector<16x1xf32>
    %198 = vector.broadcast %190 : vector<16x1xf32> to vector<16x16xf32>
    %199 = arith.subf %186, %198 : vector<16x16xf32>
    %cst_81 = arith.constant 9.99999974E-6 : f32
    %200 = vector.broadcast %cst_81 : f32 to vector<16x1xf32>
    %201 = arith.addf %197, %200 : vector<16x1xf32>
    %202 = math.rsqrt %201 : vector<16x1xf32>
    %203 = vector.broadcast %202 : vector<16x1xf32> to vector<16x16xf32>
    %204 = arith.mulf %199, %203 : vector<16x16xf32>
    %205 = vector.broadcast %184 : vector<1x16xf32> to vector<16x16xf32>
    %206 = arith.mulf %204, %205 : vector<16x16xf32>
    %207 = vector.broadcast %185 : vector<1x16xf32> to vector<16x16xf32>
    %208 = arith.addf %206, %207 : vector<16x16xf32>
    %c96 = arith.constant 96 : index
    %c0_82 = arith.constant 0 : index
    %209 = vector.load %arg2[%c96, %c0_82] : memref<192x32xf32, #tpu.memory_space<vmem>>, vector<16x32xf32>
    %cst_83 = arith.constant dense<0.000000e+00> : vector<16x32xf32>
    %210 = tpu.matmul %208, %209, %cst_83 {dimension_numbers = #tpu.dot_dimension_numbers<[1], [0], [0], [1], [0, 0, 1, 1], [], []>} : vector<16x16xf32>, vector<16x32xf32>, vector<16x32xf32> -> vector<16x32xf32>
    %c189 = arith.constant 189 : index
    %c0_84 = arith.constant 0 : index
    %211 = vector.load %arg2[%c189, %c0_84] : memref<192x32xf32, #tpu.memory_space<vmem>>, vector<1x32xf32>
    %212 = vector.broadcast %211 : vector<1x32xf32> to vector<16x32xf32>
    %213 = arith.addf %210, %212 : vector<16x32xf32>
    %cst_85 = arith.constant 0.000000e+00 : f32
    %214 = vector.broadcast %cst_85 : f32 to vector<16x32xf32>
    %215 = arith.maximumf %213, %214 : vector<16x32xf32>
    %c112 = arith.constant 112 : index
    %c0_86 = arith.constant 0 : index
    %216 = vector.load %arg2[%c112, %c0_86] : memref<192x32xf32, #tpu.memory_space<vmem>>, vector<32x16xf32>
    %cst_87 = arith.constant dense<0.000000e+00> : vector<16x16xf32>
    %217 = tpu.matmul %215, %216, %cst_87 {dimension_numbers = #tpu.dot_dimension_numbers<[1], [0], [0], [1], [0, 0, 1, 1], [], []>} : vector<16x32xf32>, vector<32x16xf32>, vector<16x16xf32> -> vector<16x16xf32>
    %c190 = arith.constant 190 : index
    %c0_88 = arith.constant 0 : index
    %218 = vector.load %arg2[%c190, %c0_88] : memref<192x32xf32, #tpu.memory_space<vmem>>, vector<1x16xf32>
    %219 = vector.broadcast %218 : vector<1x16xf32> to vector<16x16xf32>
    %220 = arith.addf %217, %219 : vector<16x16xf32>
    %cst_89 = arith.constant 0.000000e+00 : f32
    %221 = vector.broadcast %cst_89 : f32 to vector<16x16xf32>
    %222 = arith.maximumf %220, %221 : vector<16x16xf32>
    %223 = arith.addf %222, %208 : vector<16x16xf32>
    %cst_90 = arith.constant dense<0.000000e+00> : vector<16xf32>
    %224 = vector.multi_reduction <add>, %223, %cst_90 [1] : vector<16x16xf32> to vector<16xf32>
    %225 = vector.shape_cast %224 : vector<16xf32> to vector<16x1xf32>
    %cst_91 = arith.constant 1.600000e+01 : f32
    %226 = vector.broadcast %cst_91 : f32 to vector<16x1xf32>
    %227 = arith.divf %225, %226 : vector<16x1xf32>
    %228 = vector.broadcast %227 : vector<16x1xf32> to vector<16x16xf32>
    %229 = arith.subf %223, %228 : vector<16x16xf32>
    %230 = arith.mulf %229, %229 : vector<16x16xf32>
    %cst_92 = arith.constant dense<0.000000e+00> : vector<16xf32>
    %231 = vector.multi_reduction <add>, %230, %cst_92 [1] : vector<16x16xf32> to vector<16xf32>
    %232 = vector.shape_cast %231 : vector<16xf32> to vector<16x1xf32>
    %cst_93 = arith.constant 1.600000e+01 : f32
    %233 = vector.broadcast %cst_93 : f32 to vector<16x1xf32>
    %234 = arith.divf %232, %233 : vector<16x1xf32>
    %235 = vector.broadcast %227 : vector<16x1xf32> to vector<16x16xf32>
    %236 = arith.subf %223, %235 : vector<16x16xf32>
    %cst_94 = arith.constant 9.99999974E-6 : f32
    %237 = vector.broadcast %cst_94 : f32 to vector<16x1xf32>
    %238 = arith.addf %234, %237 : vector<16x1xf32>
    %239 = math.rsqrt %238 : vector<16x1xf32>
    %240 = vector.broadcast %239 : vector<16x1xf32> to vector<16x16xf32>
    %241 = arith.mulf %236, %240 : vector<16x16xf32>
    %242 = vector.broadcast %184 : vector<1x16xf32> to vector<16x16xf32>
    %243 = arith.mulf %241, %242 : vector<16x16xf32>
    %244 = vector.broadcast %185 : vector<1x16xf32> to vector<16x16xf32>
    %245 = arith.addf %243, %244 : vector<16x16xf32>
    %c144 = arith.constant 144 : index
    %c0_95 = arith.constant 0 : index
    %246 = vector.load %arg2[%c144, %c0_95] : memref<192x32xf32, #tpu.memory_space<vmem>>, vector<16x1xf32>
    %cst_96 = arith.constant dense<0.000000e+00> : vector<16x1xf32>
    %247 = tpu.matmul %245, %246, %cst_96 {dimension_numbers = #tpu.dot_dimension_numbers<[1], [0], [0], [1], [0, 0, 1, 1], [], []>} : vector<16x16xf32>, vector<16x1xf32>, vector<16x1xf32> -> vector<16x1xf32>
    %c160 = arith.constant 160 : index
    %c0_97 = arith.constant 0 : index
    %248 = vector.load %arg2[%c160, %c0_97] : memref<192x32xf32, #tpu.memory_space<vmem>>, vector<16x4xf32>
    %249 = vector.broadcast %247 : vector<16x1xf32> to vector<16x4xf32>
    %250 = arith.mulf %249, %248 : vector<16x4xf32>
    %cst_98 = arith.constant dense<0.000000e+00> : vector<4xf32>
    %251 = vector.multi_reduction <add>, %250, %cst_98 [0] : vector<16x4xf32> to vector<4xf32>
    %252 = vector.shape_cast %251 : vector<4xf32> to vector<1x4xf32>
    %c191 = arith.constant 191 : index
    %c0_99 = arith.constant 0 : index
    %253 = vector.load %arg2[%c191, %c0_99] : memref<192x32xf32, #tpu.memory_space<vmem>>, vector<1x4xf32>
    %254 = arith.addf %252, %253 : vector<1x4xf32>
    %c0_100 = arith.constant 0 : index
    %c0_101 = arith.constant 0 : index
    %c0_102 = arith.constant 0 : index
    %255 = vector.load %arg3[%c0_100, %c0_101, %c0_102] : memref<1x1x4xf32, #tpu.memory_space<vmem>>, vector<1x1x4xf32>
    %256 = vector.shape_cast %255 : vector<1x1x4xf32> to vector<1x4xf32>
    %257 = vector.shape_cast %254 : vector<1x4xf32> to vector<1x1x4xf32>
    tpu.vector_store %arg3[%c0_100, %c0_101, %c0_102], %257 {strides = array<i32>} : memref<1x1x4xf32, #tpu.memory_space<vmem>>, vector<1x1x4xf32>,
    return
  }
  func.func @transform_0(%arg0: i32) -> (i32, i32, i32) {
    %c0_i32 = arith.constant 0 : i32
    %c0_i32_0 = arith.constant 0 : i32
    %c0_i32_1 = arith.constant 0 : i32
    return %arg0, %c0_i32, %c0_i32_0 : i32, i32, i32
  }
  func.func @transform_1(%arg0: i32) -> (i32, i32) {
    %c0_i32 = arith.constant 0 : i32
    %c0_i32_0 = arith.constant 0 : i32
    %c0_i32_1 = arith.constant 0 : i32
    return %c0_i32, %c0_i32_0 : i32, i32
  }
  func.func @transform_2(%arg0: i32) -> (i32, i32, i32) {
    %c0_i32 = arith.constant 0 : i32
    %c0_i32_0 = arith.constant 0 : i32
    %c0_i32_1 = arith.constant 0 : i32
    return %arg0, %c0_i32, %c0_i32_0 : i32, i32, i32
  }
}

</mosaic_0001>

<bundles_post_ra>
// kernel: forward.1
= control target key start
LH: loop header
LB: loop body
LE: loop exit
PB: predicated region body
PF: predicated region fallthrough
CT: control target
= control target key end

     0   :  { %7 = vsyncpa [#allocation3], 0  ;;  %s3514_s0 = inlined_call_operand.vmem [shape: f32[2,16,8], index: 0, kind: input, shape index: {}]   ;;  %s3515_s1 = inlined_call_operand.vmem [shape: f32[192,32], index: 1, kind: input, shape index: {}]   ;;  %s3516_s2 = inlined_call_operand.hbm [shape: f32[2,1,4], index: 2, kind: output, shape index: {}]  }
   0x1   :  { %9 = vsyncpa [#allocation3 + $0x1], 0  ;;  %s2935_s9 = smov 0   ;;  %s2937_s10 = smov 0  }
   0x2   :  { %s2939_s11 = smov 0   ;;  %s2941_s12 = smov 0  }
   0x3 LB: > { %s2956_s13 = sadd.s32 4294967295, %s2911_s12   ;;  %s2305_s14 = sadd.s32 4294967294, %s2911_s12   ;;  %s2911_s12 = sphi %s2941_s12, %s3524_s12   ;;  %s2907_s11 = sphi %s2939_s11, %s3523_s11   ;;  %s2903_s10 = sphi %s2937_s10, %s3522_s10   ;;  %s2899_s9 = sphi %s2935_s9, %s3521_s9  }
   0x4   : > { %s2960_s15 = sadd.s32 1, %s2911_s12   ;;  %s69_s16 = sadd.s32 1, %s2907_s11 }
   0x5   : > { %s66_s17 = ssub.s32 %s2911_s12, %s2960_s15  ;;  %p79_p0 = scmp.ne.s32.totalorder %s2907_s11, %s2903_s10 }
   0x6   : > { %p67_p1 = scmp.eq.s32.totalorder %s66_s17, 0  ;;  %p80_p2 = scmp.eq.s32.totalorder %s2956_s13, 1 }
   0x7   : > { %p85_p3 = scmp.ne.s32.totalorder %s2903_s10, %s2899_s9  ;;  %p86_p4 = scmp.eq.s32.totalorder %s2305_s14, 1 }
   0x8   : > { %s2971_s18 = scalar_select %p67_p1, %s2907_s11, %s69_s16  }
   0x9   : > { %p2973_p5 = por %p80_p2, %p79_p0  ;;  %p2977_p6 = por %p86_p4, %p85_p3 }
   0xa   : > { %p2308_p7 = scmp.ge.s32.totalorder %s2911_s12, 1  ;;  %p115_p8 = scmp.lt.s32.totalorder %s2911_s12, 3 }
   0xc   : > { %p116_p9 = pnand %p2308_p7, %p115_p8 }
   0xd   : > { %v143_v0 = vld [vmem:[%s3515_s1] sm:$0xff] (!%p116_p9)  ;;  %p136_p10 = scmp.lt.s32.totalorder (!%p116_p9), %s2956_s13, 1  ;;  %vm149_vm0 = vcmask (!%p116_p9), 64512   ;;  %v256_v3 = vld [vmem:[%s3515_s1 + $0x8] sm:$0xff] (!%p116_p9)  ;;  %v2311_v4 = vld [vmem:[%s3515_s1 + $0xb0] ss:$0 sm:$0xff] (!%p116_p9)  ;;  %v233_v11 = vlaneseq (!%p116_p9) }
   0xe   : > { %119 = sbr.rel (%p116_p9) target bundleno = 5949 (0x173d), region = 28  ;;  %2483 = vmatprep.subr.mxu0 (!%p116_p9), %v143_v0  ;;  %2488 = vmatprep.subr.mxu1 (!%p116_p9), %v256_v3  ;;  %s2913_s4 = smov (!%p116_p9), 4   ;;  %vm253_vm3 = vcmask (!%p116_p9), 31744   ;;  %v361_v22 = vld [vmem:[%s3515_s1 + $0x28] sm:$0xff] (!%p116_p9)  ;;  %v2314_v23 = vld [vmem:[%s3515_s1 + $0xb1] ss:$0 sm:$0xff] (!%p116_p9) }
   0xf   : > { %2484 = vmatpush3.msra.mxu0 (!%p116_p9), %v143_v0  ;;  %2489 = vmatpush3.msra.mxu1 (!%p116_p9), %v256_v3  ;;  %v3008_v12 = vshrl.u32 (!%p116_p9), %v233_v11, 7  ;;  %v483_v39 = vld [vmem:[%s3515_s1 + $0x10] sm:$0xff] (!%p116_p9)  ;;  %vm1172_vm8 = vcmask (!%p116_p9), 1043456   ;;  %s2914_s28 = smov (!%p116_p9), 124   ;;  %vm3229_vm9 = vmpackc.low (!%p116_p9), %vm253_vm3, %vm253_vm3  ;;  %vm1483_vm11 = vcmask (!%p116_p9), 523264   ;;  %s2915_s3 = smov (!%p116_p9), 120  }
  0x10   : > { %2493 = vmatprep.subr.mxu0 (!%p116_p9), %v361_v22  ;;  %2498 = vmatprep.subr.mxu1 (!%p116_p9), %v483_v39  ;;  %v2317_v40 = vld [vmem:[%s3515_s1 + $0xb5] ss:$0 sm:$0xff] (!%p116_p9)  ;;  %v2322_v3 = vld [vmem:[%s3515_s1 + $0xb2] ss:$0 sm:$0xff] (!%p116_p9)  ;;  %s2916_s14 = smov (!%p116_p9), 8   ;;  %s2917_s16 = smov (!%p116_p9), 12  }
  0x11   : > { %vm238_vm1 = vcmp.lt.s32.totalorder (!%p116_p9), %v3008_v12, 1  ;;  %vm241_vm2 = vcmp.ge.s32.totalorder (!%p116_p9), %v3008_v12, 1  ;;  %vm466_vm4 = vcmp.lt.s32.totalorder (!%p116_p9), %v3008_v12, 2  ;;  %vm469_vm5 = vcmp.ge.s32.totalorder (!%p116_p9), %v3008_v12, 2  ;;  %s134_s30 = sand.u32 (!%p116_p9), 1, %s2903_s10   ;;  %s2393_s6 = sshll.u32 (!%p116_p9), %s2956_s13, 4 }
  0x12   : > { %vm695_vm6 = vcmp.lt.s32.totalorder (!%p116_p9), %v3008_v12, 4  ;;  %vm698_vm7 = vcmp.ge.s32.totalorder (!%p116_p9), %v3008_v12, 4  ;;  %s135_s7 = scalar_lea.vmem (!%p116_p9), [#allocation2], %s134_s30  ;;  %s2238_s17 = scalar_lea.sflag (!%p116_p9), [#allocation3], %s134_s30 }
  0x13   : > { %s2250_s8 = sshll.u32 (!%p116_p9), %s135_s7, 4  ;;  %s3474_s8 = int_to_ptr.vmem [resolvable:$true] %s2250_s8 }
  0x14   : > { %s2849_s21 = scalar_lea.vmem (!%p116_p9), %s3474_s8, 16 }
  0x15   : > { %s137_s23 = scalar_select %p136_p10, %s2956_s13, 1 }
  0x16   : > { %p2850_p11 = scmp.ne.s32.totalorder %s3474_s8, %s2849_s21  ;;  %s2919_s13 = smov [#allocation2]  }
  0x17   : > { %s2396_s24 = sshll.u32 %s137_s23, 4  ;;  %s2853_s22 = sshll.u32 %s2919_s13, 4  ;;  %s2854_s22 = int_to_ptr.vmem [resolvable:$false] %s2853_s22 }
  0x18   : > { %s140_s27 = scalar_lea.vmem %s3514_s0, %s2396_s24  ;;  %p2851_p12 = pnand %p2850_p11, %p2973_p5 }
  0x19   : > { %v141_v1 = vld [vmem:[%s140_s27] sm:$0xff]  ;;  %v142_v2 = vld [vmem:[%s140_s27 + $0x8] sm:$0xff]  ;;  %s2855_s23 = scalar_lea.vmem %s2854_s22, 32  ;;  %p2856_p0 = scmp.lt.s32.totalorder %s3474_s8, %s2854_s22 }
  0x1a   : > { %2485 = vmatprep.mubr.msk.f32.mxu0 %vm149_vm0, %v141_v1  ;;  %p2852_p13 = pneg %p2851_p12  ;;  %p2857_p1 = scmp.lt.s32.totalorder %s2855_s23, %s2849_s21 }
  0x1b   : > { %2486 = vmatmul.mubr.msk.f32.vlgmr.msra.gmra.mrb[0].mxu0 %vm149_vm0, %v142_v2  ;;  %v588_v2 = vld [vmem:[%s3515_s1 + $0x30] sm:$0xff] }
  0x1c   : > { %2494 = vmatpush3.msra.mxu0 %v361_v22  ;;  %v2325_v22 = vld [vmem:[%s3515_s1 + $0xb6] ss:$0 sm:$0xff]  ;;  %p2858_p2 = por %p2857_p1, %p2856_p0 }
  0x1d   : > { %2503 = vmatprep.subr.mxu0 %v588_v2 }
  0x1e   : > { %p2859_p3 = pnand %p2858_p2, %p2852_p13 }
  0xee   : > { %v2487_v5 = vpop.f32.mrb[0].mxu0 }
  0xef   : > { %v222_v6 = vpop.f32.mrb[1].mxu0  ;;  %v228_v8 = vadd.f32 %v2487_v5, %v2311_v4 }
  0xf0   : > { %v223_v7 = vadd.f32 %v2311_v4, %v222_v6 }
  0xf1   : > { %v3003_v10 = vmax.f32 %v228_v8, 0.0 }
  0xf2   : > { %v2999_v9 = vmax.f32 %v223_v7, 0.0 }
  0xf3   : > { %v237_v13 = vrot.slane %v3003_v10, 7 }
  0xf4   : > { %247 = vrot.lane.b32.xlu0 %v2999_v9, %s2913_s4  ;;  %v236_v14 = vrot.slane %v2999_v9, 7 }
  0xf6   : > { %v240_v15 = vsel %vm238_vm1, %v237_v13, %v236_v14  ;;  %v239_v20 = vsel %vm238_vm1, %v236_v14, %v237_v13 }
  0xf7   : > { %v243_v17 = vsel %vm241_vm2, %v240_v15, 0.0 }
  0xf8   : > { %249 = vrot.lane.b32.xlu0 %v3003_v10, %s2913_s4 }
 0x166   : > { %v248_v16 = vpop.permute.xlu0 %247 }
 0x167   : > { %v254_v18 = vsel %vm253_vm3, %v243_v17, %v248_v16 }
 0x168   : > { %2490 = vmatprep.mubr.msk.f32.mxu1 %vm149_vm0, %v254_v18 }
 0x16a   : > { %v250_v19 = vpop.permute.xlu0 %249 }
 0x16b   : > { %v255_v21 = vsel %vm253_vm3, %v239_v20, %v250_v19 }
 0x16c   : > { %2491 = vmatmul.mubr.msk.f32.vlgmr.msra.gmra.mrb[0].mxu1 %vm149_vm0, %v255_v21  ;;  %v712_v21 = vld [vmem:[%s3515_s1 + $0x18] sm:$0xff] }
 0x16d   : > { %2499 = vmatpush3.msra.mxu1 %v483_v39 }
 0x16e   : > { %2508 = vmatprep.subr.mxu1 %v712_v21 }
 0x23f   : > { %v2492_v24 = vpop.f32.mrb[0].mxu1 }
 0x240   : > { %v340_v25 = vadd.f32 %v2492_v24, %v2314_v23  ;;  %v334_v26 = vpop.f32.mrb[1].mxu1 }
 0x241   : > { %v335_v27 = vadd.f32 %v2314_v23, %v334_v26 }
 0x242   : > { %v344_v28 = vmax.f32 %v340_v25, 0.0 }
 0x243   : > { %v343_v29 = vmax.f32 %v335_v27, 0.0 }
 0x244   : > { %v346_v30 = vrot.slane %v344_v28, 7 }
 0x245   : > { %v345_v31 = vrot.slane %v343_v29, 7  ;;  %353 = vrot.lane.b32.xlu1 %v343_v29, %s2913_s4 }
 0x247   : > { %v348_v32 = vsel %vm238_vm1, %v346_v30, %v345_v31  ;;  %v347_v33 = vsel %vm238_vm1, %v345_v31, %v346_v30 }
 0x248   : > { %v349_v35 = vsel %vm241_vm2, %v348_v32, 0.0 }
 0x249   : > { %355 = vrot.lane.b32.xlu1 %v344_v28, %s2913_s4 }
 0x2b7   : > { %v354_v34 = vpop.permute.xlu1 %353 }
 0x2b8   : > { %v359_v36 = vsel %vm253_vm3, %v349_v35, %v354_v34 }
 0x2b9   : > { %2495 = vmatprep.mubr.msk.f32.mxu0 %vm149_vm0, %v359_v36 }
 0x2bb   : > { %v356_v37 = vpop.permute.xlu1 %355 }
 0x2bc   : > { %v360_v38 = vsel %vm253_vm3, %v347_v33, %v356_v37 }
 0x2bd   : > { %2496 = vmatmul.mubr.msk.f32.vlgmr.msra.gmra.mrb[2].mxu0 %vm149_vm0, %v360_v38 }
 0x2be   : > { %2504 = vmatpush3.msra.mxu0 %v588_v2 }
 0x390   : > { %v2497_v41 = vpop.f32.mrb[2].mxu0 }
 0x391   : > { %v445_v42 = vadd.f32 %v2497_v41, %v2317_v40  ;;  %v439_v43 = vpop.f32.mrb[3].mxu0 }
 0x392   : > { %v440_v44 = vadd.f32 %v2317_v40, %v439_v43 }
 0x393   : > { %v449_v45 = vmax.f32 %v445_v42, 0.0 }
 0x394   : > { %v448_v46 = vmax.f32 %v440_v44, 0.0 }
 0x395   : > { %v2321_v47 = vmul.f32 -1.442695, %v449_v45 }
 0x396   : > { %v2320_v48 = vmul.f32 -1.442695, %v448_v46 }
 0x397   : > { %2777 = vpow2.f32 %v2321_v47 }
 0x398   : > { %2779 = vpow2.f32 %v2320_v48  ;;  %v817_v48 = vld [vmem:[%s3515_s1 + $0x38] sm:$0xff] }
 0x399   : > { %2513 = vmatprep.subr.mxu0 %v817_v48 }
 0x3a1   : > { %v2778_v49 = vpop.eup %2777 }
 0x3a2   : > { %v2780_v50 = vpop.eup %2779  ;;  %v457_v51 = vadd.f32 1.0, %v2778_v49  ;;  %v2330_v49 = vld [vmem:[%s3515_s1 + $0xb3] ss:$0 sm:$0xff] }
 0x3a3   : > { %v456_v52 = vadd.f32 1.0, %v2780_v50 }
 0x3a4   : > { %2781 = vrcp.f32 %v457_v51 }
 0x3a5   : > { %2783 = vrcp.f32 %v456_v52 }
 0x3ae   : > { %v2782_v53 = vpop.eup %2781 }
 0x3af   : > { %v2784_v54 = vpop.eup %2783  ;;  %v3049_v55 = vmul.f32 %v2782_v53, %v3003_v10 }
 0x3b0   : > { %v3052_v56 = vmul.f32 %v2784_v54, %v2999_v9 }
 0x3b1   : > { %477 = vrot.lane.b32.xlu1 %v3049_v55, %s2913_s4  ;;  %v465_v58 = vrot.slane %v3049_v55, 6 }
 0x3b2   : > { %475 = vrot.lane.b32.xlu0 %v3052_v56, %s2913_s4  ;;  %v464_v57 = vrot.slane %v3052_v56, 6 }
 0x3b4   : > { %v468_v59 = vsel %vm466_vm4, %v465_v58, %v464_v57  ;;  %v467_v63 = vsel %vm466_vm4, %v464_v57, %v465_v58 }
 0x3b5   : > { %v471_v62 = vsel %vm469_vm5, %v468_v59, 0.0 }
 0x423   : > { %v478_v60 = vpop.permute.xlu1 %477 }
 0x424   : > { %v476_v61 = vpop.permute.xlu0 %475  ;;  %v482_v1 = vsel %vm253_vm3, %v467_v63, %v478_v60 }
 0x425   : > { %v481_v0 = vsel %vm253_vm3, %v471_v62, %v476_v61 }
 0x426   : > { %2500 = vmatprep.mubr.msk.f32.mxu1 %vm149_vm0, %v481_v0 }
 0x427   : > { %2501 = vmatmul.mubr.msk.f32.vlgmr.msra.gmra.mrb[2].mxu1 %vm149_vm0, %v482_v1 }
 0x428   : > { %2509 = vmatpush3.msra.mxu1 %v712_v21 }
 0x4fa   : > { %v2502_v4 = vpop.f32.mrb[2].mxu1 }
 0x4fb   : > { %v567_v5 = vadd.f32 %v2502_v4, %v2322_v3  ;;  %v561_v6 = vpop.f32.mrb[3].mxu1  ;;  %v2333_v4 = vld [vmem:[%s3515_s1 + $0xb7] ss:$0 sm:$0xff] }
 0x4fc   : > { %v562_v7 = vadd.f32 %v2322_v3, %v561_v6  ;;  %v936_v3 = vld [vmem:[%s3515_s1 + $0x20] sm:$0xff] }
 0x4fd   : > { %v571_v8 = vmax.f32 %v567_v5, 0.0  ;;  %2518 = vmatprep.subr.mxu1 %v936_v3 }
 0x4fe   : > { %v570_v9 = vmax.f32 %v562_v7, 0.0 }
 0x4ff   : > { %v573_v10 = vrot.slane %v571_v8, 6  ;;  %582 = vrot.lane.b32.xlu1 %v571_v8, %s2913_s4 }
 0x500   : > { %v572_v13 = vrot.slane %v570_v9, 6  ;;  %580 = vrot.lane.b32.xlu0 %v570_v9, %s2913_s4 }
 0x502   : > { %v574_v14 = vsel %vm466_vm4, %v572_v13, %v573_v10  ;;  %v575_v15 = vsel %vm466_vm4, %v573_v10, %v572_v13 }
 0x503   : > { %v576_v18 = vsel %vm469_vm5, %v575_v15, 0.0  ;;  %vm1753_vm5 = vcmask 97280  }
 0x571   : > { %v583_v16 = vpop.permute.xlu1 %582 }
 0x572   : > { %v581_v17 = vpop.permute.xlu0 %580  ;;  %v587_v20 = vsel %vm253_vm3, %v574_v14, %v583_v16 }
 0x573   : > { %v586_v19 = vsel %vm253_vm3, %v576_v18, %v581_v17 }
 0x574   : > { %2505 = vmatprep.mubr.msk.f32.mxu0 %vm149_vm0, %v586_v19  ;;  %v1142_v19 = vld [vmem:[%s3515_s1 + $0x48] sm:$0xf] }
 0x575   : > { %2506 = vmatmul.mubr.msk.f32.vlgmr.msra.gmra.mrb[4].mxu0 %vm149_vm0, %v587_v20 }
 0x576   : > { %2514 = vmatpush3.msra.mxu0 %v817_v48 }
 0x648   : > { %v2507_v23 = vpop.f32.mrb[4].mxu0 }
 0x649   : > { %v672_v24 = vadd.f32 %v2507_v23, %v2325_v22  ;;  %v666_v25 = vpop.f32.mrb[5].mxu0 }
 0x64a   : > { %v667_v26 = vadd.f32 %v2325_v22, %v666_v25 }
 0x64b   : > { %v676_v27 = vmax.f32 %v672_v24, 0.0 }
 0x64c   : > { %v675_v28 = vmax.f32 %v667_v26, 0.0 }
 0x64d   : > { %v2329_v29 = vmul.f32 -1.442695, %v676_v27 }
 0x64e   : > { %v2328_v30 = vmul.f32 -1.442695, %v675_v28 }
 0x64f   : > { %2785 = vpow2.f32 %v2329_v29 }
 0x650   : > { %2787 = vpow2.f32 %v2328_v30 }
 0x659   : > { %v2786_v31 = vpop.eup %2785 }
 0x65a   : > { %v2788_v32 = vpop.eup %2787  ;;  %v684_v33 = vadd.f32 1.0, %v2786_v31  ;;  %v2338_v31 = vld [vmem:[%s3515_s1 + $0xb4] ss:$0 sm:$0xff] }
 0x65b   : > { %v683_v34 = vadd.f32 1.0, %v2788_v32 }
 0x65c   : > { %2789 = vrcp.f32 %v684_v33 }
 0x65d   : > { %2791 = vrcp.f32 %v683_v34 }
 0x666   : > { %v2790_v35 = vpop.eup %2789 }
 0x667   : > { %v2792_v36 = vpop.eup %2791  ;;  %v3097_v37 = vmul.f32 %v2790_v35, %v3049_v55 }
 0x668   : > { %v3100_v38 = vmul.f32 %v2792_v36, %v3052_v56  ;;  %v3197_v36 = vld [vmem:[%s3515_s1 + $0xb9] ss:$0 sm:$0xff] }
 0x669   : > { %706 = vrot.lane.b32.xlu1 %v3097_v37, %s2913_s4  ;;  %v694_v40 = vrot.slane %v3097_v37, 4  ;;  %v3172_v29 = vsub.f32 %v3097_v37, %v3049_v55  ;;  %v1037_v55 = vld [vmem:[%s3515_s1 + $0x40] sm:$0xff] }
 0x66a   : > { %704 = vrot.lane.b32.xlu0 %v3100_v38, %s2913_s4  ;;  %v693_v39 = vrot.slane %v3100_v38, 4  ;;  %v3164_v28 = vsub.f32 %v3100_v38, %v3052_v56  ;;  %2523 = vmatprep.subr.mxu0 %v1037_v55 }
 0x66c   : > { %v697_v41 = vsel %vm695_vm6, %v694_v40, %v693_v39  ;;  %v696_v45 = vsel %vm695_vm6, %v693_v39, %v694_v40 }
 0x66d   : > { %v700_v44 = vsel %vm698_vm7, %v697_v41, 0.0 }
 0x6db   : > { %v707_v42 = vpop.permute.xlu1 %706 }
 0x6dc   : > { %v705_v43 = vpop.permute.xlu0 %704  ;;  %v711_v47 = vsel %vm253_vm3, %v696_v45, %v707_v42 }
 0x6dd   : > { %v710_v46 = vsel %vm253_vm3, %v700_v44, %v705_v43 }
 0x6de   : > { %2510 = vmatprep.mubr.msk.f32.mxu1 %vm149_vm0, %v710_v46 }
 0x6df   : > { %2511 = vmatmul.mubr.msk.f32.vlgmr.msra.gmra.mrb[4].mxu1 %vm149_vm0, %v711_v47 }
 0x6e0   : > { %2519 = vmatpush3.msra.mxu1 %v936_v3 }
 0x6e1   : > { %2528 = vmatprep.subr.msk.mxu1 %vm1172_vm8, %v1142_v19 }
 0x7b2   : > { %v2512_v50 = vpop.f32.mrb[4].mxu1 }
 0x7b3   : > { %v796_v51 = vadd.f32 %v2512_v50, %v2330_v49  ;;  %v790_v52 = vpop.f32.mrb[5].mxu1 }
 0x7b4   : > { %v791_v53 = vadd.f32 %v2330_v49, %v790_v52 }
 0x7b5   : > { %v800_v54 = vmax.f32 %v796_v51, 0.0 }
 0x7b6   : > { %v799_v57 = vmax.f32 %v791_v53, 0.0 }
 0x7b7   : > { %v802_v58 = vrot.slane %v800_v54, 4  ;;  %811 = vrot.lane.b32.xlu1 %v800_v54, %s2913_s4 }
 0x7b8   : > { %v801_v59 = vrot.slane %v799_v57, 4  ;;  %809 = vrot.lane.b32.xlu0 %v799_v57, %s2913_s4 }
 0x7ba   : > { %v803_v60 = vsel %vm695_vm6, %v801_v59, %v802_v58  ;;  %v804_v61 = vsel %vm695_vm6, %v802_v58, %v801_v59  ;;  %vm1763_vm6 = vcmask 130048  }
 0x7bb   : > { %v805_v0 = vsel %vm698_vm7, %v804_v61, 0.0  ;;  %vm2235_vm7 = vcmask 24576  }
 0x829   : > { %v812_v62 = vpop.permute.xlu1 %811 }
 0x82a   : > { %v810_v63 = vpop.permute.xlu0 %809  ;;  %v816_v2 = vsel %vm253_vm3, %v803_v60, %v812_v62 }
 0x82b   : > { %v815_v1 = vsel %vm253_vm3, %v805_v0, %v810_v63  ;;  %v2341_v0 = vld [vmem:[%s3515_s1 + $0xb8] ss:$0 sm:$0xff] }
 0x82c   : > { %2515 = vmatprep.mubr.msk.f32.mxu0 %vm149_vm0, %v815_v1 }
 0x82d   : > { %2516 = vmatmul.mubr.msk.f32.vlgmr.msra.gmra.mrb[6].mxu0 %vm149_vm0, %v816_v2 }
 0x82e   : > { %2524 = vmatpush3.msra.mxu0 %v1037_v55 }
 0x900   : > { %v2517_v5 = vpop.f32.mrb[6].mxu0 }
 0x901   : > { %v901_v6 = vadd.f32 %v2517_v5, %v2333_v4  ;;  %v895_v7 = vpop.f32.mrb[7].mxu0 }
 0x902   : > { %v896_v8 = vadd.f32 %v2333_v4, %v895_v7 }
 0x903   : > { %v905_v9 = vmax.f32 %v901_v6, 0.0 }
 0x904   : > { %v904_v10 = vmax.f32 %v896_v8, 0.0 }
 0x905   : > { %v2337_v13 = vmul.f32 -1.442695, %v905_v9 }
 0x906   : > { %v2336_v14 = vmul.f32 -1.442695, %v904_v10 }
 0x907   : > { %2793 = vpow2.f32 %v2337_v13 }
 0x908   : > { %2795 = vpow2.f32 %v2336_v14 }
 0x911   : > { %v2794_v15 = vpop.eup %2793 }
 0x912   : > { %v2796_v16 = vpop.eup %2795  ;;  %v913_v17 = vadd.f32 1.0, %v2794_v15 }
 0x913   : > { %v912_v18 = vadd.f32 1.0, %v2796_v16 }
 0x914   : > { %2797 = vrcp.f32 %v913_v17 }
 0x915   : > { %2799 = vrcp.f32 %v912_v18 }
 0x91e   : > { %v2798_v20 = vpop.eup %2797 }
 0x91f   : > { %v2800_v21 = vpop.eup %2799  ;;  %v3149_v22 = vmul.f32 %v2798_v20, %v3097_v37 }
 0x920   : > { %v3152_v23 = vmul.f32 %v2800_v21, %v3100_v38 }
 0x921   : > { %930 = vrot.lane.b32.xlu1 %v3149_v22, %s2913_s4  ;;  %v3184_v56 = vsub.f32 %v3149_v22, %v3097_v37 }
 0x922   : > { %928 = vrot.lane.b32.xlu0 %v3152_v23, %s2913_s4  ;;  %v3176_v30 = vsub.f32 %v3152_v23, %v3100_v38 }
 0x993   : > { %v931_v24 = vpop.permute.xlu1 %930 }
 0x994   : > { %v929_v25 = vpop.permute.xlu0 %928  ;;  %v935_v27 = vsel %vm253_vm3, %v3152_v23, %v931_v24 }
 0x995   : > { %v934_v26 = vsel %vm253_vm3, 0.0, %v929_v25 }
 0x996   : > { %2520 = vmatprep.mubr.msk.f32.mxu1 %vm149_vm0, %v934_v26 }
 0x997   : > { %2521 = vmatmul.mubr.msk.f32.vlgmr.msra.gmra.mrb[6].mxu1 %vm149_vm0, %v935_v27 }
 0x998   : > { %2530 = vmatprep.mubr.msk.f32.mxu1 %vm253_vm3, %v3164_v28  ;;  %2529 = vmatpush3.msk.msra.mxu1 %vm1172_vm8, %v1142_v19 }
 0x99b   : > { %2531 = vmatmul.mubr.msk.f32.vlgmr.msra.gmra.mrb[8].mxu1 %vm253_vm3, %v3172_v29 }
 0x99c   : > { %2533 = vmatprep.mubr.msk.f32.mxu1 %vm253_vm3, %v3176_v30 }
 0x99f   : > { %2534 = vmatmul.mubr.msk.f32.gmra.mrb[10].mxu1 %vm253_vm3, %v3184_v56 }
 0xa6a   : > { %v2522_v32 = vpop.f32.mrb[6].mxu1 }
 0xa6b   : > { %v1020_v33 = vadd.f32 %v2522_v32, %v2338_v31  ;;  %v1014_v34 = vpop.f32.mrb[7].mxu1 }
 0xa6c   : > { %v1015_v35 = vadd.f32 %v2338_v31, %v1014_v34 }
 0xa6d   : > { %v1024_v37 = vmax.f32 %v1020_v33, 0.0 }
 0xa6e   : > { %v1023_v38 = vmax.f32 %v1015_v35, 0.0  ;;  %v2532_v39 = vpop.f32.mrb[8].mxu1 }
 0xa6f   : > { %v3200_v40 = vadd.f32 %v2532_v39, %v3197_v36  ;;  %1031 = vrot.lane.b32.xlu1 %v1024_v37, %s2913_s4  ;;  %v1242_v41 = vpop.f32.mrb[9].mxu1 }
 0xa70   : > { %v1243_v42 = vadd.f32 %v3197_v36, %v1242_v41  ;;  %1029 = vrot.lane.b32.xlu0 %v1023_v38, %s2913_s4 }
 0xa72   : > { %v2535_v43 = vpop.f32.mrb[10].mxu1  ;;  %v3206_v44 = vpack.i.bf16 %v3200_v40, %v1243_v42 }
 0xa73   : > { %v3209_v45 = vadd.f32 %v2535_v43, %v3197_v36  ;;  %v1252_v46 = vpop.f32.mrb[11].mxu1  ;;  %v1457_v43 = vand.u32 127, %v233_v11 }
 0xa74   : > { %v3212_v47 = vadd.f32 %v3197_v36, %v1252_v46  ;;  %2736 = vrot.lane.b32.xlu0 %v3206_v44, %s2914_s28 }
 0xa76   : > { %v3218_v48 = vpack.i.bf16 %v3209_v45, %v3212_v47 }
 0xa78   : > { %2741 = vrot.lane.b32.xlu1 %v3218_v48, %s2914_s28 }
 0xae1   : > { %v1032_v49 = vpop.permute.xlu1 %1031 }
 0xae2   : > { %v1030_v50 = vpop.permute.xlu0 %1029  ;;  %v1036_v52 = vsel %vm253_vm3, %v1023_v38, %v1032_v49  ;;  %v1458_v49 = vand.u32 4294967280, %v3008_v12 }
 0xae3   : > { %v1035_v51 = vsel %vm253_vm3, 0.0, %v1030_v50 }
 0xae4   : > { %2525 = vmatprep.mubr.msk.f32.mxu0 %vm149_vm0, %v1035_v51 }
 0xae5   : > { %2526 = vmatmul.mubr.msk.f32.vlgmr.msra.gmra.mrb[8].mxu0 %vm149_vm0, %v1036_v52 }
 0xae6   : > { %v2737_v53 = vpop.permute.xlu0 %2736  ;;  %2558 = vmatprep.mubr.msk.f32.mxu0 %vm253_vm3, %v1243_v42  ;;  %v235_v42 = vadd.s32 8, %v3008_v12 }
 0xae7   : > { %v2739_v54 = vunpack.i.h.bf16 %v2737_v53  ;;  %v2738_v57 = vunpack.i.l.bf16 %v2737_v53 }
 0xae8   : > { %v1459_v46 = vand.u32 4294967280, %v235_v42 }
 0xae9   : > { %v2630_v59 = vpack.c.bf16 %v2739_v54, %v2738_v57  ;;  %v1452_v54 = vadd.s32 32, %v3008_v12 }
 0xaea   : > { %v2742_v60 = vpop.permute.xlu1 %2741 }
 0xaeb   : > { %v2744_v61 = vunpack.i.h.bf16 %v2742_v60  ;;  %v2743_v62 = vunpack.i.l.bf16 %v2742_v60  ;;  %2632 = vmatprep.subr.msk.bf16.mxu0 %vm3229_vm9, %v2630_v59 }
 0xaec   : > { %2635 = vmatpush3.bf16.xpose.msk.msra.mxu0 %vm3229_vm9, %v2630_v59  ;;  %v1453_v59 = vadd.s32 40, %v3008_v12 }
 0xaed   : > { %v2636_v63 = vpack.c.bf16 %v2744_v61, %v2743_v62 }
 0xaef   : > { %2638 = vmatprep.subr.msk.bf16.mxu0 %vm3229_vm9, %v2636_v63 }
 0xaf4   : > { %2641 = vmatpush3.bf16.xpose.msk.msra.mxu0 %vm3229_vm9, %v2636_v63 }
 0xbb8   : > { %v2527_v1 = vpop.f32.mrb[8].mxu0 }
 0xbb9   : > { %v1121_v2 = vadd.f32 %v2527_v1, %v2341_v0  ;;  %v1115_v3 = vpop.f32.mrb[9].mxu0  ;;  %v1462_v1 = vand.u32 4294967280, %v1452_v54 }
 0xbba   : > { %v1116_v4 = vadd.f32 %v2341_v0, %v1115_v3 }
 0xbbb   : > { %v1125_v5 = vmax.f32 %v1121_v2, 0.0  ;;  %v1454_v2 = vadd.s32 48, %v3008_v12 }
 0xbbc   : > { %v1124_v6 = vmax.f32 %v1116_v4, 0.0 }
 0xbbd   : > { %v2345_v7 = vmul.f32 -1.442695, %v1125_v5  ;;  %v1463_v5 = vand.u32 4294967280, %v1453_v59 }
 0xbbe   : > { %v2344_v8 = vmul.f32 -1.442695, %v1124_v6  ;;  %v1455_v6 = vadd.s32 56, %v3008_v12 }
 0xbbf   : > { %2801 = vpow2.f32 %v2345_v7 }
 0xbc0   : > { %2803 = vpow2.f32 %v2344_v8 }
 0xbc9   : > { %v2802_v9 = vpop.eup %2801 }
 0xbca   : > { %v2804_v10 = vpop.eup %2803  ;;  %v1133_v13 = vadd.f32 1.0, %v2802_v9 }
 0xbcb   : > { %v1132_v14 = vadd.f32 1.0, %v2804_v10 }
 0xbcc   : > { %2805 = vrcp.f32 %v1133_v13  ;;  %v1464_v13 = vand.u32 4294967280, %v1454_v2 }
 0xbcd   : > { %2807 = vrcp.f32 %v1132_v14 }
 0xbd6   : > { %v2806_v15 = vpop.eup %2805 }
 0xbd7   : > { %v2808_v16 = vpop.eup %2807  ;;  %v3245_v17 = vmul.f32 %v2806_v15, %v3149_v22 }
 0xbd8   : > { %v3248_v18 = vmul.f32 %v2808_v16, %v3152_v23 }
 0xbd9   : > { %v3256_v20 = vsub.f32 %v3245_v17, %v3149_v22 }
 0xbda   : > { %v3252_v19 = vsub.f32 %v3248_v18, %v3152_v23 }
 0xbdc   : > { %2536 = vmatprep.mubr.msk.f32.mxu1 %vm253_vm3, %v3252_v19 }
 0xbdd   : > { %2537 = vmatmul.mubr.msk.f32.gmra.mrb[12].mxu1 %vm253_vm3, %v3256_v20 }
 0xbde   : > { %2539 = vmatprep.mubr.msk.f32.mxu1 %vm253_vm3, %v3248_v18 }
 0xbe1   : > { %2540 = vmatmul.mubr.msk.f32.gmra.mrb[14].mxu1 %vm253_vm3, %v3245_v17 }
 0xcb0   : > { %v2538_v21 = vpop.f32.mrb[12].mxu1 }
 0xcb1   : > { %v1268_v23 = vadd.f32 %v2538_v21, %v3197_v36  ;;  %v1262_v24 = vpop.f32.mrb[13].mxu1  ;;  %v1465_v21 = vand.u32 4294967280, %v1455_v6 }
 0xcb2   : > { %v1263_v25 = vadd.f32 %v3197_v36, %v1262_v24 }
 0xcb4   : > { %v2541_v22 = vpop.f32.mrb[14].mxu1  ;;  %v3268_v26 = vpack.i.bf16 %v1268_v23, %v1263_v25 }
 0xcb5   : > { %v1278_v27 = vadd.f32 %v2541_v22, %v3197_v36  ;;  %v1272_v55 = vpop.f32.mrb[15].mxu1 }
 0xcb6   : > { %v1273_v31 = vadd.f32 %v3197_v36, %v1272_v55  ;;  %2746 = vrot.lane.b32.xlu0 %v3268_v26, %s2914_s28 }
 0xcb8   : > { %v3274_v32 = vpack.i.bf16 %v1278_v27, %v1273_v31 }
 0xcba   : > { %2751 = vrot.lane.b32.xlu1 %v3274_v32, %s2914_s28 }
 0xd28   : > { %v2747_v33 = vpop.permute.xlu0 %2746 }
 0xd29   : > { %v2749_v34 = vunpack.i.h.bf16 %v2747_v33  ;;  %v2748_v35 = vunpack.i.l.bf16 %v2747_v33 }
 0xd2b   : > { %v2642_v37 = vpack.c.bf16 %v2749_v34, %v2748_v35 }
 0xd2c   : > { %v2752_v38 = vpop.permute.xlu1 %2751 }
 0xd2d   : > { %v2754_v39 = vunpack.i.h.bf16 %v2752_v38  ;;  %v2753_v41 = vunpack.i.l.bf16 %v2752_v38  ;;  %2644 = vmatprep.subr.msk.bf16.mxu0 %vm3229_vm9, %v2642_v37 }
 0xd2e   : > { %2647 = vmatpush3.bf16.xpose.msk.msra.mxu0 %vm3229_vm9, %v2642_v37 }
 0xd2f   : > { %v2648_v36 = vpack.c.bf16 %v2754_v39, %v2753_v41 }
 0xd31   : > { %2650 = vmatprep.subr.msk.bf16.mxu0 %vm3229_vm9, %v2648_v36 }
 0xd36   : > { %2653 = vmatpush3.bf16.xpose.msk.msra.mxu0 %vm3229_vm9, %v2648_v36 }
 0xd3d   : > { %2559 = vmatmul.mubr.msk.f32.vlgmr.msra.gmra.mrb[10].mxu0 %vm253_vm3, %v3200_v40  ;;  %v1466_v40 = vand.u32 4294967280, %v1457_v43 }
 0xd3e   : > { %2561 = vmatprep.mubr.msk.f32.mxu0 %vm253_vm3, %v3212_v47  ;;  %v1450_v47 = vadd.s32 16, %v3008_v12 }
 0xd3f   : > { %vm1468_vm10 = vcmp.eq.s32.totalorder %v1459_v46, %v1466_v40  ;;  %vm1467_vm12 = vcmp.eq.s32.totalorder %v1458_v49, %v1466_v40  ;;  %vm1471_vm15 = vcmp.eq.s32.totalorder %v1462_v1, %v1466_v40  ;;  %vm1472_vm1 = vcmp.eq.s32.totalorder %v1463_v5, %v1466_v40 }
 0xd40   : > { %v1460_v53 = vand.u32 4294967280, %v1450_v47  ;;  %vm1473_vm2 = vcmp.eq.s32.totalorder %v1464_v13, %v1466_v40  ;;  %vm1474_vm4 = vcmp.eq.s32.totalorder %v1465_v21, %v1466_v40 }
 0xd41   : > { %2562 = vmatmul.mubr.msk.f32.gmra.mrb[12].mxu0 %vm253_vm3, %v3209_v45  ;;  %v1451_v45 = vadd.s32 24, %v3008_v12 }
 0xd42   : > { %2564 = vmatprep.mubr.msk.f32.mxu0 %vm253_vm3, %v1263_v25  ;;  %vm1469_vm13 = vcmp.eq.s32.totalorder %v1460_v53, %v1466_v40 }
 0xd43   : > { %v1461_v11 = vand.u32 4294967280, %v1451_v45 }
 0xd45   : > { %2565 = vmatmul.mubr.msk.f32.gmra.mrb[14].mxu0 %vm253_vm3, %v1268_v23  ;;  %vm1470_vm14 = vcmp.eq.s32.totalorder %v1461_v11, %v1466_v40 }
 0xd46   : > { %2567 = vmatprep.mubr.msk.f32.mxu0 %vm253_vm3, %v1273_v31 }
 0xd49   : > { %2568 = vmatmul.mubr.msk.f32.gmra.mrb[16].mxu0 %vm253_vm3, %v1278_v27 }
 0xe10   : > { %v2560_v50 = vpop.f32.mrb[10].mxu0 }
 0xe11   : > { %v1443_v51 = vmul.f32 0.25, %v2560_v50  ;;  %v1403_v52 = vpop.f32.mrb[11].mxu0 }
 0xe12   : > { %v1442_v57 = vmul.f32 0.25, %v1403_v52 }
 0xe13   : > { %v1476_v58 = vsel %vm1468_vm10, %v1443_v51, -1e+30 }
 0xe14   : > { %v2563_v60 = vpop.f32.mrb[12].mxu0  ;;  %v1487_v61 = vsel %vm1483_vm11, %v1476_v58, -inf  ;;  %v1475_v62 = vsel %vm1467_vm12, %v1442_v57, -1e+30 }
 0xe15   : > { %1488 = vmax.xlane.f32.xlu1 %v1487_v61  ;;  %v1413_v63 = vpop.f32.mrb[13].mxu0  ;;  %v1484_v0 = vsel %vm1483_vm11, %v1475_v62, -inf  ;;  %v1445_v3 = vmul.f32 0.25, %v2563_v60 }
 0xe16   : > { %v1444_v4 = vmul.f32 0.25, %v1413_v63  ;;  %1485 = vmax.xlane.f32.xlu0 %v1484_v0 }
 0xe17   : > { %v1478_v16 = vsel %vm1470_vm14, %v1445_v3, -1e+30 }
 0xe18   : > { %v2566_v7 = vpop.f32.mrb[14].mxu0  ;;  %v1477_v8 = vsel %vm1469_vm13, %v1444_v4, -1e+30  ;;  %v1493_v22 = vsel %vm1483_vm11, %v1478_v16, -inf }
 0xe19   : > { %v1423_v9 = vpop.f32.mrb[15].mxu0  ;;  %v1490_v10 = vsel %vm1483_vm11, %v1477_v8, -inf  ;;  %v1447_v14 = vmul.f32 0.25, %v2566_v7 }
 0xe1a   : > { %v1446_v15 = vmul.f32 0.25, %v1423_v9  ;;  %1491 = vmax.xlane.f32.xlu0 %v1490_v10 }
 0xe1b   : > { %v1480_v31 = vsel %vm1472_vm1, %v1447_v14, -1e+30 }
 0xe1c   : > { %v2569_v23 = vpop.f32.mrb[16].mxu0  ;;  %v1479_v24 = vsel %vm1471_vm15, %v1446_v15, -1e+30  ;;  %v1499_v34 = vsel %vm1483_vm11, %v1480_v31, -inf }
 0xe1d   : > { %v1433_v25 = vpop.f32.mrb[17].mxu0  ;;  %v1496_v12 = vsel %vm1483_vm11, %v1479_v24, -inf  ;;  %v1449_v27 = vmul.f32 0.25, %v2569_v23 }
 0xe1e   : > { %v1448_v55 = vmul.f32 0.25, %v1433_v25  ;;  %1494 = vmax.xlane.f32.xlu0 %v1493_v22  ;;  %1497 = vmax.xlane.f32.xlu1 %v1496_v12 }
 0xe1f   : > { %v1482_v37 = vsel %vm1474_vm4, %v1449_v27, -1e+30 }
 0xe20   : > { %v1481_v33 = vsel %vm1473_vm2, %v1448_v55, -1e+30  ;;  %v1505_v38 = vsel %vm1483_vm11, %v1482_v37, -inf }
 0xe21   : > { %v1502_v35 = vsel %vm1483_vm11, %v1481_v33, -inf }
 0xe22   : > { %1500 = vmax.xlane.f32.xlu0 %v1499_v34  ;;  %1503 = vmax.xlane.f32.xlu1 %v1502_v35 }
 0xe26   : > { %1506 = vmax.xlane.f32.xlu0 %v1505_v38 }
 0xe33   : > { %2756 = vrot.lane.b32.xlu1 %v3206_v44, %s2915_s3 }
 0xea2   : > { %v1489_v39 = vpop.xlane.xlu1 %1488 }
 0xea3   : > { %v1509_v41 = vsub.f32 %v1476_v58, %v1489_v39  ;;  %v1486_v36 = vpop.xlane.xlu0 %1485 }
 0xea4   : > { %v1508_v42 = vsub.f32 %v1475_v62, %v1486_v36 }
 0xea5   : > { %v1518_v43 = vmul.f32 1.442695, %v1509_v41 }
 0xea6   : > { %v1516_v46 = vmul.f32 1.442695, %v1508_v42 }
 0xea7   : > { %2809 = vpow2.f32 %v1518_v43  ;;  %v1492_v40 = vpop.xlane.xlu0 %1491 }
 0xea8   : > { %2811 = vpow2.f32 %v1516_v46  ;;  %v1510_v49 = vsub.f32 %v1477_v8, %v1492_v40 }
 0xeaa   : > { %v1520_v47 = vmul.f32 1.442695, %v1510_v49 }
 0xeab   : > { %v1495_v45 = vpop.xlane.xlu0 %1494  ;;  %v1498_v50 = vpop.xlane.xlu1 %1497 }
 0xeac   : > { %2813 = vpow2.f32 %v1520_v47  ;;  %v1511_v51 = vsub.f32 %v1478_v16, %v1495_v45  ;;  %v1512_v52 = vsub.f32 %v1479_v24, %v1498_v50 }
 0xeae   : > { %v1522_v53 = vmul.f32 1.442695, %v1511_v51  ;;  %v1524_v54 = vmul.f32 1.442695, %v1512_v52 }
 0xeaf   : > { %v1501_v57 = vpop.xlane.xlu0 %1500  ;;  %v1504_v44 = vpop.xlane.xlu1 %1503 }
 0xeb0   : > { %2815 = vpow2.f32 %v1522_v53  ;;  %v1513_v58 = vsub.f32 %v1480_v31, %v1501_v57  ;;  %v1514_v61 = vsub.f32 %v1481_v33, %v1504_v44 }
 0xeb1   : > { %v3315_v11 = vpop.eup %2809  ;;  %2817 = vpow2.f32 %v1524_v54 }
 0xeb2   : > { %v2812_v59 = vpop.eup %2811  ;;  %v1526_v60 = vmul.f32 1.442695, %v1513_v58  ;;  %v1535_v62 = vsel %vm1483_vm11, %v3315_v11, 0.0  ;;  %v1528_v6 = vmul.f32 1.442695, %v1514_v61 }
 0xeb3   : > { %1536 = vadd.xlane.f32.xlu0 %v1535_v62  ;;  %v1507_v63 = vpop.xlane.xlu0 %1506  ;;  %v2757_v0 = vpop.permute.xlu1 %2756  ;;  %v1532_v1 = vsel %vm1483_vm11, %v2812_v59, 0.0 }
 0xeb4   : > { %2819 = vpow2.f32 %v1526_v60  ;;  %v1515_v2 = vsub.f32 %v1482_v37, %v1507_v63  ;;  %v2759_v3 = vunpack.i.h.bf16 %v2757_v0  ;;  %v2758_v4 = vunpack.i.l.bf16 %v2757_v0  ;;  %1533 = vadd.xlane.f32.xlu1 %v1532_v1  ;;  %v1756_v0 = vld [vmem:[%s3515_s1 + $0x50] sm:$0xff]  ;;  %v1757_v1 = vld [vmem:[%s3515_s1 + $0x58] sm:$0xff] }
 0xeb6   : > { %v3320_v5 = vpop.eup %2813  ;;  %v1530_v7 = vmul.f32 1.442695, %v1515_v2  ;;  %v2654_v8 = vpack.c.bf16 %v2759_v3, %v2758_v4  ;;  %v2670_v2 = vpack.c.bf16 %v1757_v1, %v1756_v0 }
 0xeb7   : > { %v1538_v9 = vsel %vm1483_vm11, %v3320_v5, 0.0 }
 0xeb8   : > { %2821 = vpow2.f32 %v1530_v7  ;;  %1539 = vadd.xlane.f32.xlu1 %v1538_v9  ;;  %2655 = vmatprep.subr.bf16.mxu1 %v2654_v8 }
 0xeb9   : > { %2657 = vmatpush3.bf16.msra.mxu1 %v2654_v8  ;;  %2823 = vpow2.f32 %v1528_v6 }
 0xeba   : > { %v3324_v10 = vpop.eup %2815 }
 0xebb   : > { %v3326_v13 = vpop.eup %2817  ;;  %v1541_v14 = vsel %vm1483_vm11, %v3324_v10, 0.0 }
 0xebc   : > { %1542 = vadd.xlane.f32.xlu0 %v1541_v14  ;;  %v1544_v15 = vsel %vm1483_vm11, %v3326_v13, 0.0 }
 0xebd   : > { %1545 = vadd.xlane.f32.xlu1 %v1544_v15 }
 0xebe   : > { %v3332_v16 = vpop.eup %2819 }
 0xebf   : > { %v1547_v21 = vsel %vm1483_vm11, %v3332_v16, 0.0 }
 0xec0   : > { %1548 = vadd.xlane.f32.xlu0 %v1547_v21 }
 0xec2   : > { %v3336_v23 = vpop.eup %2821 }
 0xec3   : > { %v1553_v24 = vsel %vm1483_vm11, %v3336_v23, 0.0  ;;  %v2824_v25 = vpop.eup %2823 }
 0xec4   : > { %1554 = vadd.xlane.f32.xlu0 %v1553_v24  ;;  %v1550_v22 = vsel %vm1483_vm11, %v2824_v25, 0.0 }
 0xec8   : > { %1551 = vadd.xlane.f32.xlu0 %v1550_v22 }
 0xece   : > { %2766 = vrot.lane.b32.xlu1 %v3268_v26, %s2915_s3 }
 0xed2   : > { %2771 = vrot.lane.b32.xlu1 %v3274_v32, %s2915_s3 }
 0xede   : > { %2761 = vrot.lane.b32.xlu0 %v3218_v48, %s2915_s3 }
 0xf40   : > { %v1537_v27 = vpop.xlane.xlu0 %1536 }
 0xf41   : > { %v1534_v12 = vpop.xlane.xlu1 %1533 }
 0xf42   : > { %2825 = vrcp.f32 %v1534_v12 }
 0xf43   : > { %2827 = vrcp.f32 %v1537_v27  ;;  %v2380_v27 = vld [vmem:[%s3515_s1 + $0xba] ss:$0 sm:$0xff] }
 0xf45   : > { %v1540_v55 = vpop.xlane.xlu1 %1539 }
 0xf46   : > { %2829 = vrcp.f32 %v1540_v55 }
 0xf49   : > { %v1543_v31 = vpop.xlane.xlu0 %1542 }
 0xf4a   : > { %v1546_v37 = vpop.xlane.xlu1 %1545  ;;  %2831 = vrcp.f32 %v1543_v31 }
 0xf4b   : > { %2833 = vrcp.f32 %v1546_v37 }
 0xf4c   : > { %v2826_v33 = vpop.eup %2825 }
 0xf4d   : > { %v1549_v34 = vpop.xlane.xlu0 %1548  ;;  %v1564_v35 = vmul.f32 %v2826_v33, %v2812_v59  ;;  %v2828_v50 = vpop.eup %2827 }
 0xf4e   : > { %v2767_v39 = vpop.permute.xlu1 %2766  ;;  %2835 = vrcp.f32 %v1549_v34  ;;  %v1565_v52 = vmul.f32 %v2828_v50, %v3315_v11 }
 0xf4f   : > { %2586 = vmatprep.mubr.msk.f32.mxu1 %vm1483_vm11, %v1564_v35  ;;  %v2769_v36 = vunpack.i.h.bf16 %v2767_v39  ;;  %v2768_v32 = vunpack.i.l.bf16 %v2767_v39 }
 0xf50   : > { %v2830_v51 = vpop.eup %2829 }
 0xf51   : > { %v1555_v38 = vpop.xlane.xlu0 %1554  ;;  %v2662_v40 = vpack.c.bf16 %v2769_v36, %v2768_v32  ;;  %v1566_v54 = vmul.f32 %v2830_v51, %v3320_v5 }
 0xf52   : > { %v2772_v48 = vpop.permute.xlu1 %2771 }
 0xf53   : > { %v2774_v49 = vunpack.i.h.bf16 %v2772_v48  ;;  %v2773_v47 = vunpack.i.l.bf16 %v2772_v48 }
 0xf54   : > { %v2832_v53 = vpop.eup %2831 }
 0xf55   : > { %v1552_v26 = vpop.xlane.xlu0 %1551  ;;  %v2666_v45 = vpack.c.bf16 %v2774_v49, %v2773_v47  ;;  %v2834_v57 = vpop.eup %2833  ;;  %v1567_v44 = vmul.f32 %v2832_v53, %v3324_v10 }
 0xf56   : > { %2837 = vrcp.f32 %v1552_v26  ;;  %v1568_v59 = vmul.f32 %v2834_v57, %v3326_v13  ;;  %v1913_v57 = vld [vmem:[%s3515_s1 + $0x68] sm:$0xff] }
 0xf57   : > { %2839 = vrcp.f32 %v1555_v38 }
 0xf58   : > { %v2836_v58 = vpop.eup %2835 }
 0xf59   : > { %v2762_v41 = vpop.permute.xlu0 %2761  ;;  %v1569_v11 = vmul.f32 %v2836_v58, %v3332_v16  ;;  %v2002_v58 = vld [vmem:[%s3515_s1 + $0x70] sm:$0xff] }
 0xf5a   : > { %v2764_v42 = vunpack.i.h.bf16 %v2762_v41  ;;  %v2763_v43 = vunpack.i.l.bf16 %v2762_v41 }
 0xf5c   : > { %v2658_v46 = vpack.c.bf16 %v2764_v42, %v2763_v43 }
 0xf5e   : > { %2659 = vmatprep.subr.bf16.mxu1 %v2658_v46 }
 0xf5f   : > { %2661 = vmatpush3.bf16.msra.mxu1 %v2658_v46 }
 0xf60   : > { %2663 = vmatprep.subr.bf16.mxu1 %v2662_v40  ;;  %v2838_v60 = vpop.eup %2837 }
 0xf61   : > { %v2840_v61 = vpop.eup %2839  ;;  %v1570_v62 = vmul.f32 %v2838_v60, %v2824_v25 }
 0xf62   : > { %v1571_v63 = vmul.f32 %v2840_v61, %v3336_v23 }
 0xf63   : > { %2665 = vmatpush3.bf16.msra.mxu1 %v2662_v40 }
 0xf64   : > { %2667 = vmatprep.subr.bf16.mxu1 %v2666_v45 }
 0xf67   : > { %2669 = vmatpush3.bf16.msra.mxu1 %v2666_v45 }
 0xf68   : > { %2671 = vmatprep.subr.bf16.mxu1 %v2670_v2 }
 0xf6a   : > { %2587 = vmatmul.mubr.msk.f32.vlgmr.msra.gmra.mrb[16].mxu1 %vm1483_vm11, %v1565_v52 }
 0xf6b   : > { %2589 = vmatprep.mubr.msk.f32.mxu1 %vm1483_vm11, %v1566_v54  ;;  %2673 = vmatpush3.bf16.msra.mxu1 %v2670_v2  ;;  %v1912_v54 = vld [vmem:[%s3515_s1 + $0x60] sm:$0xff] }
 0xf6e   : > { %2590 = vmatmul.mubr.msk.f32.gmra.mrb[18].mxu1 %vm1483_vm11, %v1567_v44  ;;  %v2674_v44 = vpack.c.bf16 %v1913_v57, %v1912_v54 }
 0xf6f   : > { %2592 = vmatprep.mubr.msk.f32.mxu1 %vm1483_vm11, %v1568_v59  ;;  %v2003_v59 = vld [vmem:[%s3515_s1 + $0x78] sm:$0xff] }
 0xf70   : > { %2675 = vmatprep.subr.bf16.mxu1 %v2674_v44  ;;  %v2678_v60 = vpack.c.bf16 %v2003_v59, %v2002_v58 }
 0xf72   : > { %2593 = vmatmul.mubr.msk.f32.gmra.mrb[20].mxu1 %vm1483_vm11, %v1569_v11 }
 0xf73   : > { %2595 = vmatprep.mubr.msk.f32.mxu1 %vm1483_vm11, %v1570_v62 }
 0xf76   : > { %2596 = vmatmul.mubr.msk.f32.gmra.mrb[22].mxu1 %vm1483_vm11, %v1571_v63 }
0x103d   : > { %v2588_v3 = vpop.f32.mrb[16].mxu1 }
0x103e   : > { %v1686_v4 = vpop.f32.mrb[17].mxu1 }
0x1041   : > { %v2591_v5 = vpop.f32.mrb[18].mxu1 }
0x1042   : > { %1729 = vrot.lane.b32.xlu1 %v2591_v5, %s2913_s4  ;;  %v1696_v6 = vpop.f32.mrb[19].mxu1  ;;  %v3420_v5 = vld [vmem:[%s3515_s1 + $0xbc] ss:$0 sm:$0xff] }
0x1045   : > { %v2594_v7 = vpop.f32.mrb[20].mxu1 }
0x1046   : > { %1727 = vrot.lane.b32.xlu1 %v1696_v6, %s2913_s4  ;;  %v1706_v8 = vpop.f32.mrb[21].mxu1 }
0x1047   : > { %1735 = vrot.lane.b32.xlu0 %v1706_v8, %s2916_s14 }
0x1049   : > { %v2597_v9 = vpop.f32.mrb[22].mxu1 }
0x104a   : > { %1737 = vrot.lane.b32.xlu1 %v2594_v7, %s2916_s14  ;;  %v1716_v10 = vpop.f32.mrb[23].mxu1 }
0x104b   : > { %1743 = vrot.lane.b32.xlu0 %v1716_v10, %s2917_s16 }
0x104e   : > { %1745 = vrot.lane.b32.xlu1 %v2597_v9, %s2917_s16 }
0x104f   : > { %1845 = vrot.lane.b32.xlu0 %v3176_v30, %s2913_s4 }
0x1052   : > { %1847 = vrot.lane.b32.xlu1 %v3184_v56, %s2913_s4  ;;  %s3472_s4 = scalar_lea.hbm %s3516_s2, %s2393_s6 }
0x1053   : > { %1851 = vrot.lane.b32.xlu0 %v3252_v19, %s2916_s14 }
0x1056   : > { %1853 = vrot.lane.b32.xlu1 %v3256_v20, %s2916_s14 }
0x1057   : > { %1857 = vrot.lane.b32.xlu0 %v3248_v18, %s2917_s16 }
0x105a   : > { %1859 = vrot.lane.b32.xlu1 %v3245_v17, %s2917_s16 }
0x10b4   : > { %v1730_v13 = vpop.permute.xlu1 %1729 }
0x10b5   : > { %v1750_v19 = vsel %vm253_vm3, %v2588_v3, %v1730_v13  ;;  %v3415_v3 = vld [vmem:[%s3515_s1 + $0xbb] ss:$0 sm:$0xff] }
0x10b8   : > { %v1728_v14 = vpop.permute.xlu1 %1727 }
0x10b9   : > { %v1736_v15 = vpop.permute.xlu0 %1735  ;;  %v1749_v16 = vsel %vm253_vm3, %v1686_v4, %v1728_v14  ;;  %v2004_v14 = vld [vmem:[%s3515_s1 + $0x80] sm:$0xff] }
0x10ba   : > { %v1751_v30 = vsel %vm149_vm0, %v1749_v16, %v1736_v15  ;;  %v2005_v15 = vld [vmem:[%s3515_s1 + $0x88] sm:$0xff] }
0x10bb   : > { %v2682_v16 = vpack.c.bf16 %v2005_v15, %v2004_v14  ;;  %v2233_v15 = vld [vmem:[%s3515_s1 + $0xbf] sm:$0x1] }
0x10bc   : > { %v1738_v21 = vpop.permute.xlu1 %1737 }
0x10bd   : > { %v1744_v23 = vpop.permute.xlu0 %1743  ;;  %v1752_v18 = vsel %vm149_vm0, %v1750_v19, %v1738_v21  ;;  %v2385_v21 = vld [vmem:[%s3515_s1 + $0xbd] ss:$0 sm:$0xff] }
0x10be   : > { %v1754_v56 = vsel %vm1753_vm5, %v1751_v30, %v1744_v23 }
0x10bf   : > { %2602 = vmatprep.mubr.msk.f32.mxu1 %vm1763_vm6, %v1754_v56 }
0x10c0   : > { %v1746_v17 = vpop.permute.xlu1 %1745 }
0x10c1   : > { %v1755_v20 = vsel %vm1753_vm5, %v1752_v18, %v1746_v17  ;;  %v1846_v25 = vpop.permute.xlu0 %1845 }
0x10c2   : > { %2603 = vmatmul.mubr.msk.f32.vlgmr.msra.gmra.mrb[24].mxu1 %vm1763_vm6, %v1755_v20  ;;  %v1863_v35 = vsel %vm253_vm3, %v3164_v28, %v1846_v25  ;;  %v2388_v20 = vld [vmem:[%s3515_s1 + $0xbe] ss:$0 sm:$0xff] }
0x10c3   : > { %2677 = vmatpush3.bf16.msra.mxu1 %v2674_v44 }
0x10c4   : > { %v1848_v24 = vpop.permute.xlu1 %1847  ;;  %2679 = vmatprep.subr.bf16.mxu1 %v2678_v60 }
0x10c5   : > { %v1852_v12 = vpop.permute.xlu0 %1851  ;;  %v1864_v31 = vsel %vm253_vm3, %v3172_v29, %v1848_v24 }
0x10c6   : > { %v1865_v26 = vsel %vm149_vm0, %v1863_v35, %v1852_v12 }
0x10c8   : > { %v1854_v22 = vpop.permute.xlu1 %1853 }
0x10c9   : > { %v1858_v33 = vpop.permute.xlu0 %1857  ;;  %v1866_v37 = vsel %vm149_vm0, %v1864_v31, %v1854_v22  ;;  %vm2011_vm0 = vcmask 261120  }
0x10ca   : > { %v1867_v32 = vsel %vm1753_vm5, %v1865_v26, %v1858_v33 }
0x10cc   : > { %v1860_v55 = vpop.permute.xlu1 %1859 }
0x10cd   : > { %v1868_v41 = vsel %vm1753_vm5, %v1866_v37, %v1860_v55 }
0x1195   : > { %v2604_v34 = vpop.f32.mrb[24].mxu1 }
0x1196   : > { %v1842_v38 = vadd.f32 %v2604_v34, %v2380_v27  ;;  %v1836_v39 = vpop.f32.mrb[25].mxu1 }
0x1197   : > { %v1837_v36 = vadd.f32 %v2380_v27, %v1836_v39 }
0x1198   : > { %v1872_v42 = vadd.f32 %v1868_v41, %v1842_v38 }
0x1199   : > { %v1871_v43 = vadd.f32 %v1867_v32, %v1837_v36 }
0x119a   : > { %v1876_v29 = vsel %vm1763_vm6, %v1872_v42, 0.0 }
0x119b   : > { %1877 = vadd.xlane.f32.xlu1 %v1876_v29  ;;  %v1873_v48 = vsel %vm1763_vm6, %v1871_v43, 0.0 }
0x119c   : > { %1874 = vadd.xlane.f32.xlu0 %v1873_v48  ;;  %v2127_v48 = vld [vmem:[%s3515_s1 + $0x90] sm:$0xff] }
0x1228   : > { %v1878_v28 = vpop.xlane.xlu1 %1877 }
0x1229   : > { %v1881_v46 = vmul.f32 0.0625, %v1878_v28  ;;  %v1875_v40 = vpop.xlane.xlu0 %1874  ;;  %v2128_v28 = vld [vmem:[%s3515_s1 + $0x98] sm:$0xff] }
0x122a   : > { %v1880_v49 = vmul.f32 0.0625, %v1875_v40  ;;  %v2918_v40 = vmov 0  }
0x122b   : > { %v1883_v47 = vsub.f32 %v1872_v42, %v1881_v46  ;;  %v2686_v46 = vpack.c.bf16 %v2128_v28, %v2127_v48  ;;  %2776 = vset.pattern.permute.xlu0 %v2918_v40  ;;  %2775 = vset.pattern.permute.xlu1 %v2918_v40 }
0x122c   : > { %v1882_v45 = vsub.f32 %v1871_v43, %v1880_v49 }
0x122d   : > { %v1885_v52 = vmul.f32 %v1883_v47, %v1883_v47  ;;  %2687 = vmatprep.subr.bf16.mxu0 %v2686_v46 }
0x122e   : > { %v1884_v50 = vmul.f32 %v1882_v45, %v1882_v45  ;;  %2689 = vmatpush3.bf16.msra.mxu0 %v2686_v46 }
0x122f   : > { %v1889_v53 = vsel %vm1763_vm6, %v1885_v52, 0.0 }
0x1230   : > { %v1886_v51 = vsel %vm1763_vm6, %v1884_v50, 0.0 }
0x1231   : > { %1887 = vadd.xlane.f32.xlu0 %v1886_v51 }
0x1235   : > { %1890 = vadd.xlane.f32.xlu0 %v1889_v53 }
0x12be   : > { %v1888_v11 = vpop.xlane.xlu0 %1887 }
0x12bf   : > { %v1892_v61 = vmul.f32 0.0625, %v1888_v11 }
0x12c1   : > { %v1894_v62 = vadd.f32 1e-05, %v1892_v61 }
0x12c2   : > { %v1891_v63 = vpop.xlane.xlu0 %1890 }
0x12c3   : > { %2841 = vrsqrt.f32 %v1894_v62  ;;  %v1893_v0 = vmul.f32 0.0625, %v1891_v63  ;;  %v2211_v63 = vld [vmem:[%s3515_s1 + $0xa8] sm:$0xff] }
0x12c5   : > { %v1895_v1 = vadd.f32 1e-05, %v1893_v0  ;;  %v2210_v0 = vld [vmem:[%s3515_s1 + $0xa0] sm:$0xff] }
0x12c7   : > { %2843 = vrsqrt.f32 %v1895_v1 }
0x12cd   : > { %v2842_v2 = vpop.eup %2841 }
0x12ce   : > { %v1898_v4 = vmul.f32 %v2842_v2, %v1882_v45 }
0x12d0   : > { %v1904_v6 = vmul.f32 %v3415_v3, %v1898_v4 }
0x12d1   : > { %v2844_v7 = vpop.eup %2843 }
0x12d2   : > { %v1899_v8 = vmul.f32 %v2844_v7, %v1883_v47  ;;  %v1910_v9 = vadd.f32 %v3420_v5, %v1904_v6 }
0x12d4   : > { %2609 = vmatprep.mubr.msk.f32.mxu1 %vm1763_vm6, %v1910_v9  ;;  %v1905_v10 = vmul.f32 %v3415_v3, %v1899_v8 }
0x12d6   : > { %v1911_v13 = vadd.f32 %v3420_v5, %v1905_v10 }
0x12d8   : > { %2610 = vmatmul.mubr.msk.f32.vlgmr.msra.gmra.mrb[26].mxu1 %vm1763_vm6, %v1911_v13 }
0x12d9   : > { %2681 = vmatpush3.bf16.msra.mxu1 %v2678_v60 }
0x12da   : > { %2683 = vmatprep.subr.bf16.mxu1 %v2682_v16 }
0x12dd   : > { %2685 = vmatpush3.bf16.msra.mxu1 %v2682_v16 }
0x13ab   : > { %v2611_v30 = vpop.f32.mrb[26].mxu1 }
0x13ac   : > { %v1997_v23 = vadd.f32 %v2611_v30, %v2385_v21  ;;  %v1991_v56 = vpop.f32.mrb[27].mxu1 }
0x13ad   : > { %v1992_v19 = vadd.f32 %v2385_v21, %v1991_v56 }
0x13ae   : > { %v2001_v17 = vmax.f32 %v1997_v23, 0.0 }
0x13af   : > { %v2000_v18 = vmax.f32 %v1992_v19, 0.0 }
0x13b1   : > { %2620 = vmatprep.mubr.msk.f32.mxu1 %vm2011_vm0, %v2000_v18 }
0x13b2   : > { %2621 = vmatmul.mubr.msk.f32.vlgmr.msra.gmra.mrb[28].mxu1 %vm2011_vm0, %v2001_v17 }
0x1485   : > { %v2622_v24 = vpop.f32.mrb[28].mxu1 }
0x1486   : > { %v2090_v25 = vadd.f32 %v2622_v24, %v2388_v20  ;;  %v2084_v22 = vpop.f32.mrb[29].mxu1 }
0x1487   : > { %v2085_v12 = vadd.f32 %v2388_v20, %v2084_v22 }
0x1488   : > { %v2094_v27 = vmax.f32 %v2090_v25, 0.0 }
0x1489   : > { %v2093_v55 = vmax.f32 %v2085_v12, 0.0 }
0x148a   : > { %v2096_v31 = vadd.f32 %v2094_v27, %v1911_v13 }
0x148b   : > { %v2095_v33 = vadd.f32 %v2093_v55, %v1910_v9 }
0x148c   : > { %v2100_v34 = vsel %vm1763_vm6, %v2096_v31, 0.0 }
0x148d   : > { %2101 = vadd.xlane.f32.xlu0 %v2100_v34  ;;  %v2097_v35 = vsel %vm1763_vm6, %v2095_v33, 0.0 }
0x148e   : > { %2098 = vadd.xlane.f32.xlu1 %v2097_v35 }
0x151a   : > { %v2102_v37 = vpop.xlane.xlu0 %2101 }
0x151b   : > { %v2104_v38 = vmul.f32 0.0625, %v2102_v37  ;;  %v2099_v39 = vpop.xlane.xlu1 %2098 }
0x151c   : > { %v2103_v26 = vmul.f32 0.0625, %v2099_v39 }
0x151d   : > { %v2106_v41 = vsub.f32 %v2096_v31, %v2104_v38 }
0x151e   : > { %v2105_v36 = vsub.f32 %v2095_v33, %v2103_v26 }
0x151f   : > { %v2108_v32 = vmul.f32 %v2106_v41, %v2106_v41 }
0x1520   : > { %v2107_v42 = vmul.f32 %v2105_v36, %v2105_v36 }
0x1521   : > { %v2112_v43 = vsel %vm1763_vm6, %v2108_v32, 0.0 }
0x1522   : > { %2113 = vadd.xlane.f32.xlu0 %v2112_v43  ;;  %v2109_v29 = vsel %vm1763_vm6, %v2107_v42, 0.0 }
0x1523   : > { %2110 = vadd.xlane.f32.xlu1 %v2109_v29 }
0x15af   : > { %v2114_v49 = vpop.xlane.xlu0 %2113 }
0x15b0   : > { %v2116_v47 = vmul.f32 0.0625, %v2114_v49  ;;  %v2111_v45 = vpop.xlane.xlu1 %2110 }
0x15b1   : > { %v2115_v50 = vmul.f32 0.0625, %v2111_v45 }
0x15b2   : > { %v2118_v51 = vadd.f32 1e-05, %v2116_v47 }
0x15b3   : > { %v2117_v52 = vadd.f32 1e-05, %v2115_v50 }
0x15b4   : > { %2845 = vrsqrt.f32 %v2118_v51 }
0x15b5   : > { %2847 = vrsqrt.f32 %v2117_v52 }
0x15be   : > { %v2846_v53 = vpop.eup %2845 }
0x15bf   : > { %v2848_v54 = vpop.eup %2847  ;;  %v2122_v57 = vmul.f32 %v2846_v53, %v2106_v41 }
0x15c0   : > { %v2121_v44 = vmul.f32 %v2848_v54, %v2105_v36 }
0x15c1   : > { %v2124_v58 = vmul.f32 %v3415_v3, %v2122_v57 }
0x15c2   : > { %v2123_v59 = vmul.f32 %v3415_v3, %v2121_v44 }
0x15c3   : > { %v2126_v11 = vadd.f32 %v3420_v5, %v2124_v58 }
0x15c4   : > { %v2125_v60 = vadd.f32 %v3420_v5, %v2123_v59 }
0x15c6   : > { %2627 = vmatprep.mubr.msk.f32.mxu0 %vm1763_vm6, %v2125_v60 }
0x15c7   : > { %2628 = vmatmul.mubr.msk.f32.vlgmr.msra.gmra.mrb[18].mxu0 %vm1763_vm6, %v2126_v11 }
0x169a   : > { %v2629_v61 = vpop.f32.mrb[18].mxu0 }
0x169b   : > { %2219 = vperm.xlu0 %2776, %v2629_v61   ;;  %v2201_v62 = vpop.f32.mrb[19].mxu0 }
0x169c   : > { %2214 = vperm.xlu1 %2775, %v2201_v62  }
0x171a   : > { %v2220_v1 = vpop.permute.xlu0 %2219 }
0x171b   : > { %v2223_v2 = vmul.f32 %v2220_v1, %v2211_v63  ;;  %v2215_v3 = vpop.permute.xlu1 %2214 }
0x171c   : > { %v2222_v4 = vmul.f32 %v2215_v3, %v2210_v0 }
0x171d   : > { %v2225_v5 = vsel %vm253_vm3, %v2223_v2, 0.0 }
0x171e   : > { %v2224_v6 = vsel %vm253_vm3, %v2222_v4, 0.0 }
0x171f   : > { %v2226_v7 = vadd.f32 %v2225_v5, %v2224_v6 }
0x1721   : > { %v2227_v8 = vrot.slane %v2226_v7, 4 }
0x1723   : > { %v2228_v9 = vadd.f32 %v2227_v8, %v2226_v7 }
0x1725   : > { %v2229_v10 = vrot.slane %v2228_v9, 2 }
0x1727   : > { %v2230_v13 = vadd.f32 %v2229_v10, %v2228_v9 }
0x1729   : > { %v2231_v14 = vrot.slane %v2230_v13, 1 }
0x172b   : > { %v2232_v16 = vadd.f32 %v2231_v14, %v2230_v13 }
0x172d   : > { %v2234_v21 = vadd.f32 %v2233_v15, %v2232_v16 }
0x172f   : > { %2236 = vst.msk [vmem:[%s135_s7] sm:$0x1] %vm2235_vm7, %v2234_v21 }
0x1730   : > { %2862 = shalt.err (!%p2859_p3)
}
0x1731   : > { %s2863_s24 = scalar_lea.hbm %s3472_s4, 16  ;;  %s2867_s27 = scalar_lea.hbm %s3516_s2, 32 }
0x1732   : > { %p2864_p4 = scmp.ne.s32.totalorder %s3472_s4, %s2863_s24  ;;  %p2868_p9 = scmp.lt.u32.totalorder %s3472_s4, %s3516_s2 }
0x1733   : > { %p2869_p10 = scmp.lt.u32.totalorder %s2867_s27, %s2863_s24  ;;  %p2871_p12 = scmp.lt.u32.totalorder %s2863_s24, %s3472_s4 }
0x1734   : > { %p2865_p7 = pnand %p2864_p4, %p2973_p5 }
0x1735   : > { %p2870_p11 = por %p2869_p10, %p2868_p9 }
0x1736   : > { %p2866_p8 = pneg %p2865_p7 }
0x1737   : > { %p2872_p13 = por %p2871_p12, %p2870_p11 }
0x1739   : > { %p2873_p0 = pnand %p2872_p13, %p2866_p8 }
0x173b   : > { %2876 = shalt.err (!%p2873_p0)
}
0x173c   : > { %2690 = dma.vmem_to_hbm [thread:$0]  (%p2973_p5), %s3474_s8, 16, %s3472_s4, %s2238_s17  }
0x173d PF: > { %p2696_p1 = scmp.ge.s32.totalorder %s2911_s12, 2  ;;  %s2262_s30 = sand.u32 1, %s2899_s9  }
0x173e   : > { %s2263_s3 = scalar_lea.sflag [#allocation3], %s2262_s30 }
0x173f   : > { %p2693_p2 = pnand %p2696_p1, %p2977_p6 }
0x1741   : > { %2894 = dma.done.wait (!%p2693_p2), %s2263_s3, 16  }
0x1742   : > { %2896 = vsyncadd (!%p2693_p2), %s2263_s3, 4294967280  ;;  %p12_p3 = scmp.ge.s32.totalorder %s2960_s15, 4   ;;  %s3521_s9 = smov %s2903_s10 }
0x1743   : > { %s3522_s10 = smov %s2907_s11  ;;  %s3523_s11 = smov %s2971_s18 }
0x1744   : > { %s3524_s12 = smov %s2960_s15  ;;  %14 = sbr.rel (!%p12_p3) target bundleno = 3 (0x3), region = 63 }
0x174b   :  { %2267 = vsyncpa [#allocation3], 1 }
0x174c   :  { %2269 = vsyncpa [#allocation3 + $0x1], 1 }

</bundles_post_ra>
